<compile_context>
chip_gen: v5e
topology: v5e:2x2
jax: 0.10.0
libtpu: 0.0.40
codegen_flags: <defaults>
</compile_context>

<pallas_src>
import jax
import jax.numpy as jnp
from jax import lax
from jax.experimental import pallas as pl
from jax.experimental.pallas import tpu as pltpu

MLPMAT_INNER_SIZE = 64                     # K
LANES = 128
ROWS_PER_PACK = (MLPMAT_INNER_SIZE * MLPMAT_INNER_SIZE) // LANES   # 32
ROW_CHUNK = 8                              # rows per inner compute step


def _round_up(x, m):
    return ((x + m - 1) // m) * m


def _apply_matrix_kernel(m_ref, attn_ref, vt_ref, utp_ref, out_ref,
                         vlo_sc, vhi_sc, w_sc):
    # m_ref   : (TILE, 32, 128)  lane-dense packing of the per-row (64,64) matrices
    # attn_ref: (TILE, D)
    # vt_ref  : (D, K)   = V^T
    # utp_ref : (K, D)   = (U with even/odd-permuted columns)^T
    # out_ref : (TILE, D)
    # vlo_sc  : (TILE, 128) f32 scratch, lanes 0:64  = v, lanes 64:128 = 0
    # vhi_sc  : (TILE, 128) f32 scratch, lanes 0:64  = 0, lanes 64:128 = v
    # w_sc    : (TILE, K)  f32 scratch, w in even/odd-packed column order
    tile = m_ref.shape[0]
    n_chunks = tile // ROW_CHUNK

    # (1) v[t, k] = sum_d V[k, d] * attn[t, d]  -- one tile-wide MXU matmul.
    vproj = jnp.dot(attn_ref[...], vt_ref[...],
                    preferred_element_type=jnp.float32)          # (TILE, K)
    z = jnp.zeros_like(vproj)
    vlo_sc[...] = jnp.concatenate([vproj, z], axis=-1)            # [v | 0]
    vhi_sc[...] = jnp.concatenate([z, vproj], axis=-1)            # [0 | v]

    # (2) w[t, i] = sum_j m[t, i, j] * v[t, j]  -- batched mat-vec on the packed
    #     layout.  Packed row r holds matrix rows 2r (lanes<64) and 2r+1
    #     (lanes>=64); multiplying by [v|0] / [0|v] and doing a full 128-lane
    #     reduce yields the even / odd output rows with no relayout of m.
    def body(c, carry):
        r0 = pl.multiple_of(c * ROW_CHUNK, ROW_CHUNK)
        rows = pl.ds(r0, ROW_CHUNK)
        mp = m_ref[rows, :, :].astype(jnp.float32)                # (RC, 32, 128)
        vlo = vlo_sc[rows, :][:, None, :]                         # (RC, 1, 128)
        vhi = vhi_sc[rows, :][:, None, :]                         # (RC, 1, 128)
        w_even = jnp.sum(mp * vlo, axis=-1)                       # (RC, 32) = w[t, 2r]
        w_odd = jnp.sum(mp * vhi, axis=-1)                        # (RC, 32) = w[t, 2r+1]
        w_sc[rows, :] = jnp.concatenate([w_even, w_odd], axis=-1)  # packed order
        return carry

    lax.fori_loop(0, n_chunks, body, 0, unroll=2)

    # (3) out[t, d] = sum_i U[d, i] * w[t, i]   -- one tile-wide MXU matmul
    #     against the column-permuted U (matches w's even/odd packing).
    out = jnp.dot(w_sc[...], utp_ref[...], preferred_element_type=jnp.float32)
    out_ref[...] = out.astype(out_ref.dtype)


def apply_matrix_from_few_params(m, attn, U, V, *, row_tile=1024):
    """m: (B, T, K*K), attn: (B, T, D), U: (D, K), V: (K, D) -> (B, T, D)."""
    B_, T_, matnumparams = m.shape
    K = MLPMAT_INNER_SIZE
    assert K * K == matnumparams, f"MLPMAT misconfig {K} {matnumparams}"
    D = attn.shape[-1]
    assert U.shape == (D, K) and V.shape == (K, D)

    BT = B_ * T_
    # Row tile: multiple of ROW_CHUNK (=8, also satisfies the sublane granule),
    # never uselessly larger than the (rounded) row count.
    tile = min(row_tile, _round_up(BT, ROW_CHUNK))
    tile = _round_up(tile, ROW_CHUNK)
    grid = pl.cdiv(BT, tile)   # ragged tail handled by Pallas partial blocks

    # Lane-dense packing of m: pure, contiguous reshape (no HBM copy).
    m_rows = m.reshape(BT, ROWS_PER_PACK, LANES)
    attn_rows = attn.reshape(BT, D)
    vt = V.T                                                       # (D, K)
    # Column permutation of U that matches the even/odd packing of w produced
    # by the kernel: columns [0,2,...,62, 1,3,...,63].
    ut_perm = jnp.concatenate([U[:, 0::2], U[:, 1::2]], axis=1).T  # (K, D)

    itemsize = jnp.dtype(m.dtype).itemsize
    cost = pl.CostEstimate(
        flops=2 * BT * (D * K + K * K + K * D),
        transcendentals=0,
        bytes_accessed=(BT * (K * K + 2 * D) + 2 * D * K) * itemsize,
    )

    out_rows = pl.pallas_call(
        _apply_matrix_kernel,
        out_shape=jax.ShapeDtypeStruct((BT, D), attn.dtype),
        grid_spec=pltpu.PrefetchScalarGridSpec(
            num_scalar_prefetch=0,
            grid=(grid,),
            in_specs=[
                pl.BlockSpec((tile, ROWS_PER_PACK, LANES), lambda i: (i, 0, 0)),
                pl.BlockSpec((tile, D), lambda i: (i, 0)),
                pl.BlockSpec((D, K), lambda i: (0, 0)),
                pl.BlockSpec((K, D), lambda i: (0, 0)),
            ],
            out_specs=pl.BlockSpec((tile, D), lambda i: (i, 0)),
            scratch_shapes=[
                pltpu.VMEM((tile, LANES), jnp.float32),   # [v | 0]
                pltpu.VMEM((tile, LANES), jnp.float32),   # [0 | v]
                pltpu.VMEM((tile, K), jnp.float32),       # packed w
            ],
        ),
        compiler_params=pltpu.CompilerParams(
            dimension_semantics=("parallel",),
            vmem_limit_bytes=48 * 1024 * 1024,
        ),
        cost_estimate=cost,
    )(m_rows, attn_rows, vt, ut_perm)

    return out_rows.reshape(B_, T_, D)


def _reference(m, attn, U, V):
    B_, T_, _ = m.shape
    K = MLPMAT_INNER_SIZE
    m4 = m.reshape(B_, T_, K, K)
    v = jnp.einsum("kd,btd->btk", V, attn)          # V @ attn
    w = jnp.einsum("btij,btj->bti", m4, v)          # m @ (V @ attn)
    return jnp.einsum("dk,btk->btd", U, w)          # U @ (...)


if __name__ == "__main__":
    K_ = MLPMAT_INNER_SIZE
    D_ = 128

    key = jax.random.PRNGKey(0)
    k_u, k_v, k_m1, k_a1, k_m2, k_a2 = jax.random.split(key, 6)

    # Deterministic parameter init: normal(mean=0, std=0.02), as in the module.
    U = (0.02 * jax.random.normal(k_u, (D_, K_))).astype(jnp.float32)
    V = (0.02 * jax.random.normal(k_v, (K_, D_))).astype(jnp.float32)

    # Test 1: small shape, single tile.
    B1, T1 = 2, 8
    m1 = jax.random.normal(k_m1, (B1, T1, K_ * K_), dtype=jnp.float32)
    a1 = jax.random.normal(k_a1, (B1, T1, D_), dtype=jnp.float32)
    out1 = jax.block_until_ready(apply_matrix_from_few_params(m1, a1, U, V))
    ref1 = _reference(m1, a1, U, V)
    assert out1.shape == (B1, T1, D_)
    assert jnp.allclose(out1, ref1, atol=1e-3, rtol=1e-3)

    # Test 2: B*T not a multiple of the row tile -> exercises the cdiv grid,
    # the partial final block (no host-side padding), and the multi-chunk loop.
    B2, T2 = 3, 24            # BT = 72, row_tile = 32 -> grid 3, last block ragged
    m2 = jax.random.normal(k_m2, (B2, T2, K_ * K_), dtype=jnp.float32)
    a2 = jax.random.normal(k_a2, (B2, T2, D_), dtype=jnp.float32)
    out2 = jax.block_until_ready(
        apply_matrix_from_few_params(m2, a2, U, V, row_tile=32))
    ref2 = _reference(m2, a2, U, V)
    assert out2.shape == (B2, T2, D_)
    assert jnp.allclose(out2, ref2, atol=1e-3, rtol=1e-3)

    print("KERNEL_OK")
</pallas_src>

<mosaic_0001>
module attributes {stable_mosaic.version = 11 : i64} {
  func.func @_apply_matrix_kernel(%arg0: i32, %arg1: memref<16x32x128xf32, #tpu.memory_space<vmem>>, %arg2: memref<16x128xf32, #tpu.memory_space<vmem>>, %arg3: memref<128x64xf32, #tpu.memory_space<vmem>>, %arg4: memref<64x128xf32, #tpu.memory_space<vmem>>, %arg5: memref<16x128xf32, #tpu.memory_space<vmem>>, %arg6: memref<16x128xf32, #tpu.memory_space<vmem>>, %arg7: memref<16x128xf32, #tpu.memory_space<vmem>>, %arg8: memref<16x64xf32, #tpu.memory_space<vmem>>) attributes {dimension_semantics = [#tpu.dimension_semantics<parallel>], iteration_bounds = array<i64: 1>, scalar_prefetch = 0 : i64, scratch_operands = 3 : i64, tpu.core_type = #tpu.core_type<tc>, window_params = [{transform_indices = @transform_0, window_bounds = array<i64: 16, 32, 128>}, {transform_indices = @transform_1, window_bounds = array<i64: 16, 128>}, {pipeline_mode = #tpu.pipeline_mode<synchronous>, transform_indices = @transform_2, window_bounds = array<i64: 128, 64>}, {pipeline_mode = #tpu.pipeline_mode<synchronous>, transform_indices = @transform_3, window_bounds = array<i64: 64, 128>}, {transform_indices = @transform_4, window_bounds = array<i64: 16, 128>}]} {
    %c0 = arith.constant 0 : index
    %c0_0 = arith.constant 0 : index
    %0 = vector.load %arg2[%c0, %c0_0] : memref<16x128xf32, #tpu.memory_space<vmem>>, vector<16x128xf32>
    %c0_1 = arith.constant 0 : index
    %c0_2 = arith.constant 0 : index
    %1 = vector.load %arg3[%c0_1, %c0_2] : memref<128x64xf32, #tpu.memory_space<vmem>>, vector<128x64xf32>
    %cst = arith.constant dense<0.000000e+00> : vector<16x64xf32>
    %2 = tpu.matmul %0, %1, %cst {dimension_numbers = #tpu.dot_dimension_numbers<[1], [0], [0], [1], [0, 0, 1, 1], [], []>} : vector<16x128xf32>, vector<128x64xf32>, vector<16x64xf32> -> vector<16x64xf32>
    %cst_3 = arith.constant 0.000000e+00 : f32
    %3 = vector.broadcast %cst_3 : f32 to vector<16x64xf32>
    %4 = tpu.concatenate %2, %3 in 1 : vector<16x64xf32>, vector<16x64xf32> -> vector<16x128xf32>
    %c0_4 = arith.constant 0 : index
    %c0_5 = arith.constant 0 : index
    %5 = vector.load %arg6[%c0_4, %c0_5] : memref<16x128xf32, #tpu.memory_space<vmem>>, vector<16x128xf32>
    tpu.vector_store %arg6[%c0_4, %c0_5], %4 {strides = array<i32>} : memref<16x128xf32, #tpu.memory_space<vmem>>, vector<16x128xf32>,
    %6 = tpu.concatenate %3, %2 in 1 : vector<16x64xf32>, vector<16x64xf32> -> vector<16x128xf32>
    %c0_6 = arith.constant 0 : index
    %c0_7 = arith.constant 0 : index
    %7 = vector.load %arg7[%c0_6, %c0_7] : memref<16x128xf32, #tpu.memory_space<vmem>>, vector<16x128xf32>
    tpu.vector_store %arg7[%c0_6, %c0_7], %6 {strides = array<i32>} : memref<16x128xf32, #tpu.memory_space<vmem>>, vector<16x128xf32>,
    %c0_i32 = arith.constant 0 : i32
    %c8_i32 = arith.constant 8 : i32
    %8 = arith.muli %c0_i32, %c8_i32 : i32
    %9 = tpu.assume_multiple %8, 8 : i32
    %10 = arith.index_cast %9 : i32 to index
    %c0_8 = arith.constant 0 : index
    %c0_9 = arith.constant 0 : index
    %11 = vector.load %arg1[%10, %c0_8, %c0_9] : memref<16x32x128xf32, #tpu.memory_space<vmem>>, vector<8x32x128xf32>
    %12 = arith.index_cast %9 : i32 to index
    %c0_10 = arith.constant 0 : index
    %13 = vector.load %arg6[%12, %c0_10] : memref<16x128xf32, #tpu.memory_space<vmem>>, vector<8x128xf32>
    %14 = vector.shape_cast %13 : vector<8x128xf32> to vector<8x1x128xf32>
    %15 = arith.index_cast %9 : i32 to index
    %c0_11 = arith.constant 0 : index
    %16 = vector.load %arg7[%15, %c0_11] : memref<16x128xf32, #tpu.memory_space<vmem>>, vector<8x128xf32>
    %17 = vector.shape_cast %16 : vector<8x128xf32> to vector<8x1x128xf32>
    %18 = vector.broadcast %14 : vector<8x1x128xf32> to vector<8x32x128xf32>
    %19 = arith.mulf %11, %18 : vector<8x32x128xf32>
    %cst_12 = arith.constant dense<0.000000e+00> : vector<8x32xf32>
    %20 = vector.multi_reduction <add>, %19, %cst_12 [2] : vector<8x32x128xf32> to vector<8x32xf32>
    %21 = vector.broadcast %17 : vector<8x1x128xf32> to vector<8x32x128xf32>
    %22 = arith.mulf %11, %21 : vector<8x32x128xf32>
    %cst_13 = arith.constant dense<0.000000e+00> : vector<8x32xf32>
    %23 = vector.multi_reduction <add>, %22, %cst_13 [2] : vector<8x32x128xf32> to vector<8x32xf32>
    %24 = tpu.concatenate %20, %23 in 1 : vector<8x32xf32>, vector<8x32xf32> -> vector<8x64xf32>
    %25 = arith.index_cast %9 : i32 to index
    %c0_14 = arith.constant 0 : index
    %26 = vector.load %arg8[%25, %c0_14] : memref<16x64xf32, #tpu.memory_space<vmem>>, vector<8x64xf32>
    tpu.vector_store %arg8[%25, %c0_14], %24 {strides = array<i32>} : memref<16x64xf32, #tpu.memory_space<vmem>>, vector<8x64xf32>,
    %c1_i32 = arith.constant 1 : i32
    %c8_i32_15 = arith.constant 8 : i32
    %27 = arith.muli %c1_i32, %c8_i32_15 : i32
    %28 = tpu.assume_multiple %27, 8 : i32
    %29 = arith.index_cast %28 : i32 to index
    %c0_16 = arith.constant 0 : index
    %c0_17 = arith.constant 0 : index
    %30 = vector.load %arg1[%29, %c0_16, %c0_17] : memref<16x32x128xf32, #tpu.memory_space<vmem>>, vector<8x32x128xf32>
    %31 = arith.index_cast %28 : i32 to index
    %c0_18 = arith.constant 0 : index
    %32 = vector.load %arg6[%31, %c0_18] : memref<16x128xf32, #tpu.memory_space<vmem>>, vector<8x128xf32>
    %33 = vector.shape_cast %32 : vector<8x128xf32> to vector<8x1x128xf32>
    %34 = arith.index_cast %28 : i32 to index
    %c0_19 = arith.constant 0 : index
    %35 = vector.load %arg7[%34, %c0_19] : memref<16x128xf32, #tpu.memory_space<vmem>>, vector<8x128xf32>
    %36 = vector.shape_cast %35 : vector<8x128xf32> to vector<8x1x128xf32>
    %37 = vector.broadcast %33 : vector<8x1x128xf32> to vector<8x32x128xf32>
    %38 = arith.mulf %30, %37 : vector<8x32x128xf32>
    %cst_20 = arith.constant dense<0.000000e+00> : vector<8x32xf32>
    %39 = vector.multi_reduction <add>, %38, %cst_20 [2] : vector<8x32x128xf32> to vector<8x32xf32>
    %40 = vector.broadcast %36 : vector<8x1x128xf32> to vector<8x32x128xf32>
    %41 = arith.mulf %30, %40 : vector<8x32x128xf32>
    %cst_21 = arith.constant dense<0.000000e+00> : vector<8x32xf32>
    %42 = vector.multi_reduction <add>, %41, %cst_21 [2] : vector<8x32x128xf32> to vector<8x32xf32>
    %43 = tpu.concatenate %39, %42 in 1 : vector<8x32xf32>, vector<8x32xf32> -> vector<8x64xf32>
    %44 = arith.index_cast %28 : i32 to index
    %c0_22 = arith.constant 0 : index
    %45 = vector.load %arg8[%44, %c0_22] : memref<16x64xf32, #tpu.memory_space<vmem>>, vector<8x64xf32>
    tpu.vector_store %arg8[%44, %c0_22], %43 {strides = array<i32>} : memref<16x64xf32, #tpu.memory_space<vmem>>, vector<8x64xf32>,
    %c2_i32 = arith.constant 2 : i32
    %c0_23 = arith.constant 0 : index
    %c0_24 = arith.constant 0 : index
    %46 = vector.load %arg8[%c0_23, %c0_24] : memref<16x64xf32, #tpu.memory_space<vmem>>, vector<16x64xf32>
    %c0_25 = arith.constant 0 : index
    %c0_26 = arith.constant 0 : index
    %47 = vector.load %arg4[%c0_25, %c0_26] : memref<64x128xf32, #tpu.memory_space<vmem>>, vector<64x128xf32>
    %cst_27 = arith.constant dense<0.000000e+00> : vector<16x128xf32>
    %48 = tpu.matmul %46, %47, %cst_27 {dimension_numbers = #tpu.dot_dimension_numbers<[1], [0], [0], [1], [0, 0, 1, 1], [], []>} : vector<16x64xf32>, vector<64x128xf32>, vector<16x128xf32> -> vector<16x128xf32>
    %c0_28 = arith.constant 0 : index
    %c0_29 = arith.constant 0 : index
    %49 = vector.load %arg5[%c0_28, %c0_29] : memref<16x128xf32, #tpu.memory_space<vmem>>, vector<16x128xf32>
    tpu.vector_store %arg5[%c0_28, %c0_29], %48 {strides = array<i32>} : memref<16x128xf32, #tpu.memory_space<vmem>>, vector<16x128xf32>,
    return
  }
  func.func @transform_0(%arg0: i32) -> (i32, i32, i32) {
    %c0_i32 = arith.constant 0 : i32
    %c0_i32_0 = arith.constant 0 : i32
    %c0_i32_1 = arith.constant 0 : i32
    return %arg0, %c0_i32, %c0_i32_0 : i32, i32, i32
  }
  func.func @transform_1(%arg0: i32) -> (i32, i32) {
    %c0_i32 = arith.constant 0 : i32
    %c0_i32_0 = arith.constant 0 : i32
    return %arg0, %c0_i32 : i32, i32
  }
  func.func @transform_2(%arg0: i32) -> (i32, i32) {
    %c0_i32 = arith.constant 0 : i32
    %c0_i32_0 = arith.constant 0 : i32
    %c0_i32_1 = arith.constant 0 : i32
    return %c0_i32, %c0_i32_0 : i32, i32
  }
  func.func @transform_3(%arg0: i32) -> (i32, i32) {
    %c0_i32 = arith.constant 0 : i32
    %c0_i32_0 = arith.constant 0 : i32
    %c0_i32_1 = arith.constant 0 : i32
    return %c0_i32, %c0_i32_0 : i32, i32
  }
  func.func @transform_4(%arg0: i32) -> (i32, i32) {
    %c0_i32 = arith.constant 0 : i32
    %c0_i32_0 = arith.constant 0 : i32
    return %arg0, %c0_i32 : i32, i32
  }
}

</mosaic_0001>

<bundles_post_ra>
// kernel: tpu_custom_call.1
= control target key start
LH: loop header
LB: loop body
LE: loop exit
PB: predicated region body
PF: predicated region fallthrough
CT: control target
= control target key end

     0   :  { %9 = vsyncpa [#allocation6], 0  ;;  %s1981_s0 = inlined_call_operand.hbm [shape: f32[16,32,128], index: 0, kind: input, shape index: {}]   ;;  %s1982_s1 = inlined_call_operand.vmem [shape: f32[16,128], index: 1, kind: input, shape index: {}]   ;;  %s1983_s2 = inlined_call_operand.vmem [shape: f32[128,64], index: 2, kind: input, shape index: {}]   ;;  %s1984_s3 = inlined_call_operand.vmem [shape: f32[64,128], index: 3, kind: input, shape index: {}]   ;;  %s1985_s4 = inlined_call_operand.hbm [shape: f32[16,128], index: 4, kind: output, shape index: {}]  }
   0x1   :  { %10 = vsyncpa [#allocation7], 0  ;;  %s15_s17 = sshll.u32 %s1981_s0, 4  ;;  %s1194_s18 = smov [#allocation5]   ;;  %s16_s17 = int_to_ptr.hbm [resolvable:$true] %s15_s17 }
   0x2   :  { %s17_s19 = sshll.u32 %s1194_s18, 4  ;;  %s1195_s20 = smov 128   ;;  %s18_s19 = int_to_ptr.vmem [resolvable:$true] %s17_s19 }
   0x3   :  { %s1196_s21 = smov 8  }
   0x4   :  { %23 = dma.hbm_to_vmem [thread:$0]  %s16_s17, 8192, %s18_s19, [#allocation6], %s1195_s20, %s1195_s20, %s1196_s21  }
   0x5   :  { %1190 = dma.done.wait [#allocation6], 8192  }
   0x6   :  { %1191 = vsyncadd [#allocation6], 4294959104  ;;  %v51_v0 = vld [vmem:[%s1983_s2 + $0x78] sm:$0xff]  ;;  %v50_v1 = vld [vmem:[%s1983_s2 + $0x70] sm:$0xff]  ;;  %vm75_vm0 = vcmask 523264   ;;  %vm405_vm1 = vcmask 130112  }
   0x7   :  { %52 = vmatpush.msra.mxu0 %v51_v0  ;;  %1121 = vmatpush.msra.mxu2 %v51_v0  ;;  %v49_v2 = vld [vmem:[%s1983_s2 + $0x68] sm:$0xff]  ;;  %v48_v3 = vld [vmem:[%s1983_s2 + $0x60] sm:$0xff]  ;;  %v47_v4 = vld [vmem:[%s1983_s2 + $0x58] sm:$0xff]  ;;  %vm409_vm2 = vcmask 195712   ;;  %vm413_vm3 = vcmask 261312   ;;  %vm464_vm4 = vcmask 1041409  }
   0x8   :  { %v46_v5 = vld [vmem:[%s1983_s2 + $0x50] sm:$0xff]  ;;  %v45_v6 = vld [vmem:[%s1983_s2 + $0x48] sm:$0xff]  ;;  %v44_v7 = vld [vmem:[%s1983_s2 + $0x40] sm:$0xff]  ;;  %vm466_vm5 = vcmask 1042434   ;;  %vm468_vm6 = vcmask 1043459   ;;  %vm470_vm7 = vcmask 1044484  }
   0x9   :  { %53 = vmatpush.msra.mxu0 %v50_v1  ;;  %1122 = vmatpush.msra.mxu2 %v50_v1  ;;  %v43_v8 = vld [vmem:[%s1983_s2 + $0x38] sm:$0xff]  ;;  %v42_v9 = vld [vmem:[%s1983_s2 + $0x30] sm:$0xff]  ;;  %v41_v10 = vld [vmem:[%s1983_s2 + $0x28] sm:$0xff]  ;;  %vm472_vm8 = vcmask 1045509   ;;  %vm474_vm9 = vcmask 1046534   ;;  %vm476_vm10 = vcmask 1047559  }
   0xa   :  { %v40_v11 = vld [vmem:[%s1983_s2 + $0x20] sm:$0xff]  ;;  %v39_v12 = vld [vmem:[%s1983_s2 + $0x18] sm:$0xff]  ;;  %v38_v13 = vld [vmem:[%s1983_s2 + $0x10] sm:$0xff]  ;;  %vm515_vm11 = vcmask 392512   ;;  %vm519_vm12 = vcmask 458112   ;;  %vm523_vm13 = vcmask 523712  }
   0xb   :  { %54 = vmatpush.msra.mxu0 %v49_v2  ;;  %1123 = vmatpush.msra.mxu2 %v49_v2  ;;  %v37_v14 = vld [vmem:[%s1983_s2 + $0x8] sm:$0xff]  ;;  %v36_v15 = vld [vmem:[%s1983_s2] sm:$0xff]  ;;  %s1197_s2 = smov 64   ;;  %v1289_v21 = vld [vmem:[#allocation5] sm:$0xff]  ;;  %vm582_vm14 = vcmask 261120   ;;  %s1105_s0 = sshll.u32 %s1985_s4, 4  ;;  %s1106_s0 = int_to_ptr.hbm [resolvable:$true] %s1105_s0 }
   0xc   :  { %v34_v16 = vld [vmem:[%s1982_s1] sm:$0xff]  ;;  %v35_v17 = vld [vmem:[%s1982_s1 + $0x8] sm:$0xff]  ;;  %v1299_v27 = vld [vmem:[#allocation5 + $0x8] sm:$0xff] }
   0xd   :  { %55 = vmatpush.msra.mxu0 %v48_v3  ;;  %1124 = vmatpush.msra.mxu2 %v48_v3  ;;  %v1287_v20 = vld [vmem:[#allocation5 + $0x10] sm:$0xff]  ;;  %v1297_v26 = vld [vmem:[#allocation5 + $0x18] sm:$0xff]  ;;  %v1306_v33 = vld [vmem:[#allocation5 + $0x28] sm:$0xff] }
   0xe   :  { %v1304_v32 = vld [vmem:[#allocation5 + $0x30] sm:$0xff]  ;;  %v1311_v38 = vld [vmem:[#allocation5 + $0x40] sm:$0xff]  ;;  %v1313_v39 = vld [vmem:[#allocation5 + $0x38] sm:$0xff] }
   0xf   :  { %56 = vmatpush.msra.mxu0 %v47_v4  ;;  %1125 = vmatpush.msra.mxu2 %v47_v4  ;;  %v1317_v42 = vld [vmem:[#allocation5 + $0x50] sm:$0xff]  ;;  %v1319_v43 = vld [vmem:[#allocation5 + $0x48] sm:$0xff]  ;;  %v1324_v48 = vld [vmem:[#allocation5 + $0x60] sm:$0xff] }
  0x10   :  { %v1326_v49 = vld [vmem:[#allocation5 + $0x58] sm:$0xff]  ;;  %v1330_v52 = vld [vmem:[#allocation5 + $0x20] sm:$0xff]  ;;  %v1333_v54 = vld [vmem:[#allocation5 + $0x70] sm:$0xff] }
  0x11   :  { %57 = vmatpush.msra.mxu0 %v46_v5  ;;  %1126 = vmatpush.msra.mxu2 %v46_v5  ;;  %v1335_v55 = vld [vmem:[#allocation5 + $0x68] sm:$0xff]  ;;  %v1343_v62 = vld [vmem:[#allocation5 + $0x80] sm:$0xff]  ;;  %v1345_v63 = vld [vmem:[#allocation5 + $0x78] sm:$0xff] }
  0x12   :  { %v1340_v60 = vld [vmem:[#allocation5 + $0x88] sm:$0xff]  ;;  %v1350_v4 = vld [vmem:[#allocation5 + $0xa0] sm:$0xff] }
  0x13   :  { %58 = vmatpush.msra.mxu0 %v45_v6  ;;  %1127 = vmatpush.msra.mxu2 %v45_v6  ;;  %v1353_v6 = vld [vmem:[#allocation5 + $0x98] sm:$0xff] }
  0x15   :  { %59 = vmatpush.msra.mxu0 %v44_v7  ;;  %1128 = vmatpush.msra.mxu2 %v44_v7  ;;  %v1355_v7 = vld [vmem:[#allocation5 + $0x90] sm:$0xff] }
  0x17   :  { %60 = vmatpush.msra.mxu0 %v43_v8  ;;  %1129 = vmatpush.msra.mxu2 %v43_v8 }
  0x19   :  { %61 = vmatpush.msra.mxu0 %v42_v9  ;;  %1130 = vmatpush.msra.mxu2 %v42_v9 }
  0x1b   :  { %62 = vmatpush.msra.mxu0 %v41_v10  ;;  %1131 = vmatpush.msra.mxu2 %v41_v10  ;;  %v1359_v10 = vld [vmem:[#allocation5 + $0xb8] sm:$0xff] }
  0x1d   :  { %63 = vmatpush.msra.mxu0 %v40_v11  ;;  %1132 = vmatpush.msra.mxu2 %v40_v11 }
  0x1f   :  { %64 = vmatpush.msra.mxu0 %v39_v12  ;;  %1133 = vmatpush.msra.mxu2 %v39_v12  ;;  %v1362_v12 = vld [vmem:[#allocation5 + $0xb0] sm:$0xff] }
  0x21   :  { %65 = vmatpush.msra.mxu0 %v38_v13  ;;  %1134 = vmatpush.msra.mxu2 %v38_v13  ;;  %v1364_v13 = vld [vmem:[#allocation5 + $0xa8] sm:$0xff] }
  0x23   :  { %66 = vmatpush.msra.mxu0 %v37_v14  ;;  %1135 = vmatpush.msra.mxu2 %v37_v14 }
  0x25   :  { %67 = vmatpush.msra.mxu0 %v36_v15  ;;  %1136 = vmatpush.msra.mxu2 %v36_v15 }
  0x26   :  { %68 = vmatmul.f32.vlgmr.msra.gmra.mxu0 %v34_v16  ;;  %71 = vmatmul.f32.vlgmr.msra.gmra.mxu2 %v35_v17 }
  0xa3   :  { %v69_v18 = vpop.f32.mrf.mxu0 }
  0xa4   :  { %v1285_v19 = vsel %vm75_vm0, %v69_v18, 0.0  ;;  %82 = vrot.lane.b32.xlu0 %v69_v18, %s1197_s2  ;;  %v1369_v18 = vld [vmem:[#allocation5 + $0xd0] sm:$0xff] }
  0xa5   :  { %v144_v22 = vperm.slane %v1285_v19, 0  ;;  %v128_v30 = vrot.slane %v1285_v19, 1  ;;  %v129_v36 = vrot.slane %v1285_v19, 2  ;;  %v130_v46 = vrot.slane %v1285_v19, 3 }
  0xa6   :  { %v131_v56 = vrot.slane %v1285_v19, 4  ;;  %v132_v0 = vrot.slane %v1285_v19, 5  ;;  %v133_v14 = vrot.slane %v1285_v19, 6 }
  0xa7   :  { %v162_v23 = vmul.f32 %v144_v22, %v1287_v20  ;;  %v160_v24 = vmul.f32 %v144_v22, %v1289_v21  ;;  %v163_v28 = vmul.f32 %v144_v22, %v1297_v26  ;;  %v161_v29 = vmul.f32 %v144_v22, %v1299_v27 }
  0xa8   :  { %v145_v31 = vperm.slane %v128_v30, 0  ;;  %v146_v37 = vperm.slane %v129_v36, 0  ;;  %v147_v47 = vperm.slane %v130_v46, 0  ;;  %v148_v59 = vperm.slane %v131_v56, 0  ;;  %v1382_v36 = vld [vmem:[#allocation5 + $0xe0] sm:$0xff] }
  0xa9   :  { %196 = vadd.xlane.f32.xlu2 %v162_v23  ;;  %192 = vadd.xlane.f32.xlu1 %v160_v24  ;;  %v1294_v25 = vpop.f32.mrf.mxu2  ;;  %v149_v3 = vperm.slane %v132_v0, 0  ;;  %v150_v17 = vperm.slane %v133_v14, 0  ;;  %v1372_v23 = vld [vmem:[#allocation5 + $0xc8] sm:$0xff]  ;;  %v1374_v24 = vld [vmem:[#allocation5 + $0xc0] sm:$0xff] }
  0xaa   :  { %v166_v34 = vmul.f32 %v145_v31, %v1304_v32  ;;  %v165_v35 = vmul.f32 %v145_v31, %v1306_v33  ;;  %v168_v40 = vmul.f32 %v146_v37, %v1311_v38  ;;  %v167_v41 = vmul.f32 %v145_v31, %v1313_v39 }
  0xab   :  { %v170_v44 = vmul.f32 %v146_v37, %v1317_v42  ;;  %v169_v45 = vmul.f32 %v146_v37, %v1319_v43  ;;  %v172_v50 = vmul.f32 %v147_v47, %v1324_v48  ;;  %v171_v51 = vmul.f32 %v146_v37, %v1326_v49  ;;  %v1384_v37 = vld [vmem:[#allocation5 + $0xd8] sm:$0xff] }
  0xac   :  { %84 = vrot.lane.b32.xlu0 %v1294_v25, %s1197_s2  ;;  %v164_v53 = vmul.f32 %v145_v31, %v1330_v52  ;;  %v174_v57 = vmul.f32 %v147_v47, %v1333_v54  ;;  %v173_v58 = vmul.f32 %v147_v47, %v1335_v55  ;;  %v177_v61 = vmul.f32 %v148_v59, %v1340_v60 }
  0xad   :  { %v176_v1 = vmul.f32 %v148_v59, %v1343_v62  ;;  %v175_v2 = vmul.f32 %v147_v47, %v1345_v63  ;;  %v180_v5 = vmul.f32 %v149_v3, %v1350_v4  ;;  %v179_v8 = vmul.f32 %v148_v59, %v1353_v6  ;;  %v1396_v47 = vld [vmem:[#allocation5 + $0xf8] sm:$0xff] }
  0xae   :  { %v178_v9 = vmul.f32 %v148_v59, %v1355_v7  ;;  %v183_v11 = vmul.f32 %v149_v3, %v1359_v10  ;;  %v182_v15 = vmul.f32 %v149_v3, %v1362_v12  ;;  %v181_v16 = vmul.f32 %v149_v3, %v1364_v13  ;;  %v1415_v3 = vld [vmem:[#allocation5 + $0x140] sm:$0xff] }
  0xaf   :  { %v186_v22 = vmul.f32 %v150_v17, %v1369_v18  ;;  %v184_v30 = vmul.f32 %v150_v17, %v1374_v24  ;;  %2003 = vst [vmem:[#allocation12_spill] sm:$0xff] %v1415_v3 }
  0xb1   :  { %198 = vadd.xlane.f32.xlu2 %v163_v28  ;;  %194 = vadd.xlane.f32.xlu1 %v161_v29  ;;  %v134_v28 = vrot.slane %v1285_v19, 7  ;;  %v185_v29 = vmul.f32 %v150_v17, %v1372_v23 }
  0xb3   :  { %v151_v31 = vperm.slane %v134_v28, 0  ;;  %v400_v28 = vlaneseq }
  0xb5   :  { %v188_v19 = vmul.f32 %v151_v31, %v1382_v36 }
  0xb9   :  { %204 = vadd.xlane.f32.xlu2 %v166_v34  ;;  %202 = vadd.xlane.f32.xlu1 %v165_v35  ;;  %v1379_v34 = vld [vmem:[#allocation5 + $0xe8] sm:$0xff] }
  0xba   :  { %v189_v35 = vmul.f32 %v151_v31, %v1379_v34 }
  0xc1   :  { %208 = vadd.xlane.f32.xlu2 %v168_v40  ;;  %206 = vadd.xlane.f32.xlu1 %v167_v41  ;;  %v1388_v40 = vsel %vm75_vm0, %v1294_v25, 0.0  ;;  %v187_v41 = vmul.f32 %v150_v17, %v1384_v37  ;;  %v191_v25 = vmul.f32 %v151_v31, %v1396_v47 }
  0xc2   :  { %2002 = vst [vmem:[#allocation11_spill] sm:$0xff] %v1388_v40  ;;  %v623_v59 = vrot.slane %v1388_v40, 2  ;;  %v624_v14 = vrot.slane %v1388_v40, 3 }
  0xc4   :  { %v642_v17 = vperm.slane %v624_v14, 0 }
  0xc9   :  { %212 = vadd.xlane.f32.xlu2 %v170_v44  ;;  %210 = vadd.xlane.f32.xlu1 %v169_v45  ;;  %v639_v44 = vperm.slane %v1388_v40, 0  ;;  %v1393_v45 = vld [vmem:[#allocation5 + $0x108] sm:$0xff] }
  0xcb   :  { %v656_v46 = vmul.f32 %v639_v44, %v1393_v45 }
  0xd1   :  { %216 = vadd.xlane.f32.xlu2 %v172_v50  ;;  %214 = vadd.xlane.f32.xlu1 %v171_v51  ;;  %v1398_v50 = vld [vmem:[#allocation5 + $0xf0] sm:$0xff] }
  0xd2   :  { %v190_v51 = vmul.f32 %v151_v31, %v1398_v50 }
  0xd6   :  { %200 = vadd.xlane.f32.xlu0 %v164_v53  ;;  %v1402_v53 = vld [vmem:[#allocation5 + $0x118] sm:$0xff] }
  0xd7   :  { %v658_v56 = vmul.f32 %v639_v44, %v1402_v53 }
  0xd9   :  { %220 = vadd.xlane.f32.xlu2 %v174_v57  ;;  %218 = vadd.xlane.f32.xlu1 %v173_v58  ;;  %v1405_v57 = vld [vmem:[#allocation5 + $0x100] sm:$0xff]  ;;  %v1407_v58 = vld [vmem:[#allocation5 + $0x110] sm:$0xff] }
  0xda   :  { %v657_v0 = vmul.f32 %v639_v44, %v1407_v58 }
  0xde   :  { %226 = vadd.xlane.f32.xlu0 %v177_v61  ;;  %v655_v61 = vmul.f32 %v639_v44, %v1405_v57  ;;  %v1434_v44 = vand.u32 127, %v400_v28 }
  0xe1   :  { %224 = vadd.xlane.f32.xlu2 %v176_v1  ;;  %222 = vadd.xlane.f32.xlu1 %v175_v2  ;;  %v622_v1 = vrot.slane %v1388_v40, 1  ;;  %v1413_v2 = vperm.slane %v623_v59, 0  ;;  %v1444_v59 = vld [vmem:[#allocation5 + $0x180] sm:$0xff] }
  0xe2   :  { %2007 = vst [vmem:[#allocation16_spill] sm:$0xff] %v1444_v59 }
  0xe6   :  { %232 = vadd.xlane.f32.xlu0 %v180_v5  ;;  %v640_v5 = vperm.slane %v622_v1, 0 }
  0xe9   :  { %230 = vadd.xlane.f32.xlu2 %v179_v8  ;;  %228 = vadd.xlane.f32.xlu1 %v178_v9  ;;  %v663_v8 = vmul.f32 %v1413_v2, %v1415_v3  ;;  %v1419_v9 = vld [vmem:[#allocation5 + $0x128] sm:$0xff] }
  0xee   :  { %238 = vadd.xlane.f32.xlu0 %v183_v11  ;;  %v1421_v11 = vld [vmem:[#allocation5 + $0x120] sm:$0xff] }
  0xf1   :  { %236 = vadd.xlane.f32.xlu2 %v182_v15  ;;  %234 = vadd.xlane.f32.xlu1 %v181_v16  ;;  %v660_v15 = vmul.f32 %v640_v5, %v1419_v9  ;;  %v659_v16 = vmul.f32 %v640_v5, %v1421_v11 }
  0xf6   :  { %244 = vadd.xlane.f32.xlu0 %v186_v22  ;;  %v1426_v22 = vld [vmem:[#allocation5 + $0x160] sm:$0xff] }
  0xf7   :  { %2004 = vst [vmem:[#allocation13_spill] sm:$0xff] %v1426_v22  ;;  %v667_v31 = vmul.f32 %v642_v17, %v1426_v22 }
  0xf9   :  { %242 = vadd.xlane.f32.xlu2 %v185_v29  ;;  %240 = vadd.xlane.f32.xlu1 %v184_v30 }
  0xfe   :  { %250 = vadd.xlane.f32.xlu0 %v189_v35  ;;  %v1429_v35 = vld [vmem:[#allocation5 + $0x130] sm:$0xff] }
 0x101   :  { %248 = vadd.xlane.f32.xlu2 %v188_v19  ;;  %246 = vadd.xlane.f32.xlu1 %v187_v41  ;;  %v1431_v19 = vld [vmem:[#allocation5 + $0x148] sm:$0xff]  ;;  %v625_v41 = vrot.slane %v1388_v40, 4 }
 0x102   :  { %2005 = vst [vmem:[#allocation14_spill] sm:$0xff] %v1431_v19 }
 0x106   :  { %689 = vadd.xlane.f32.xlu0 %v656_v46  ;;  %v661_v46 = vmul.f32 %v640_v5, %v1429_v35 }
 0x109   :  { %254 = vadd.xlane.f32.xlu2 %v191_v25  ;;  %252 = vadd.xlane.f32.xlu1 %v190_v51  ;;  %v664_v25 = vmul.f32 %v1413_v2, %v1431_v19  ;;  %v1439_v51 = vperm.slane %v625_v41, 0 }
 0x10b   :  { %2006 = vst [vmem:[#allocation15_spill] sm:$0xff] %v1439_v51  ;;  %v671_v14 = vmul.f32 %v1439_v51, %v1444_v59 }
 0x10e   :  { %693 = vadd.xlane.f32.xlu0 %v658_v56  ;;  %v1442_v56 = vadd.s32 4294967288, %v1434_v44 }
 0x111   :  { %687 = vadd.xlane.f32.xlu2 %v655_v61  ;;  %691 = vadd.xlane.f32.xlu1 %v657_v0  ;;  %v1447_v61 = vadd.s32 4294967280, %v1434_v44  ;;  %v1450_v0 = vadd.s32 4294967272, %v1434_v44 }
 0x116   :  { %703 = vadd.xlane.f32.xlu0 %v663_v8 }
 0x119   :  { %697 = vadd.xlane.f32.xlu2 %v660_v15  ;;  %695 = vadd.xlane.f32.xlu1 %v659_v16  ;;  %v1454_v15 = vld [vmem:[#allocation5 + $0x150] sm:$0xff]  ;;  %v1456_v16 = vld [vmem:[#allocation5 + $0x138] sm:$0xff] }
 0x11a   :  { %2008 = vst [vmem:[#allocation17_spill] sm:$0xff] %v1454_v15  ;;  %v665_v59 = vmul.f32 %v1413_v2, %v1454_v15  ;;  %v662_v3 = vmul.f32 %v640_v5, %v1456_v16  ;;  %v626_v5 = vrot.slane %v1388_v40, 5  ;;  %v1492_v40 = vld [vmem:[#allocation5 + $0x158] sm:$0xff] }
 0x11b   :  { %2009 = vst [vmem:[#allocation18_spill] sm:$0xff] %v1456_v16  ;;  %v1490_v16 = vld [vmem:[#allocation5 + $0x1a0] sm:$0xff] }
 0x11c   :  { %v197_v29 = vpop.xlane.xlu2 %196  ;;  %v193_v30 = vpop.xlane.xlu1 %192  ;;  %2015 = vst [vmem:[#allocation24_spill] sm:$0xff] %v1490_v16 }
 0x11d   :  { %v402_v28 = vperm.slane %v193_v30, %v1434_v44  ;;  %v408_v41 = vperm.slane %v197_v29, %v1447_v61 }
 0x11e   :  { %711 = vadd.xlane.f32.xlu0 %v667_v31 }
 0x121   :  { %699 = vadd.xlane.f32.xlu2 %v661_v46  ;;  %705 = vadd.xlane.f32.xlu1 %v664_v25 }
 0x124   :  { %v199_v1 = vpop.xlane.xlu2 %198  ;;  %v195_v8 = vpop.xlane.xlu1 %194 }
 0x125   :  { %v404_v31 = vperm.slane %v195_v8, %v1442_v56  ;;  %v412_v46 = vperm.slane %v199_v1, %v1450_v0  ;;  %v1470_v8 = vld [vmem:[#allocation5 + $0x178] sm:$0xff] }
 0x126   :  { %719 = vadd.xlane.f32.xlu0 %v671_v14  ;;  %2010 = vst [vmem:[#allocation19_spill] sm:$0xff] %v1470_v8  ;;  %v670_v1 = vmul.f32 %v642_v17, %v1470_v8 }
 0x127   :  { %v406_v25 = vsel %vm405_vm1, %v404_v31, %v402_v28  ;;  %v1477_v28 = vld [vmem:[#allocation5 + $0x170] sm:$0xff]  ;;  %v1479_v31 = vld [vmem:[#allocation5 + $0x168] sm:$0xff] }
 0x128   :  { %v410_v22 = vsel %vm409_vm2, %v408_v41, %v406_v25  ;;  %2011 = vst [vmem:[#allocation20_spill] sm:$0xff] %v1477_v28  ;;  %v1486_v41 = vld [vmem:[#allocation5 + $0x1a8] sm:$0xff] }
 0x129   :  { %v1468_v30 = vsel %vm413_vm3, %v412_v46, %v410_v22  ;;  %707 = vadd.xlane.f32.xlu2 %v665_v59  ;;  %701 = vadd.xlane.f32.xlu1 %v662_v3  ;;  %2012 = vst [vmem:[#allocation21_spill] sm:$0xff] %v1479_v31  ;;  %v669_v22 = vmul.f32 %v642_v17, %v1477_v28  ;;  %v1484_v3 = vperm.slane %v626_v5, 0  ;;  %v83_v46 = vpop.permute.xlu0 %82 }
 0x12a   :  { %v668_v59 = vmul.f32 %v642_v17, %v1479_v31  ;;  %2014 = vst [vmem:[#allocation23_spill] sm:$0xff] %v1486_v41  ;;  %v666_v5 = vmul.f32 %v1413_v2, %v1492_v40  ;;  %v1503_v31 = vld [vmem:[#allocation5 + $0x188] sm:$0xff] }
 0x12b   :  { %2013 = vst [vmem:[#allocation22_spill] sm:$0xff] %v1484_v3  ;;  %v676_v15 = vmul.f32 %v1484_v3, %v1486_v41  ;;  %v675_v17 = vmul.f32 %v1484_v3, %v1490_v16 }
 0x12c   :  { %v1472_v29 = vpop.xlane.xlu2 %204  ;;  %v1474_v14 = vpop.xlane.xlu1 %202 }
 0x12e   :  { %717 = vadd.xlane.f32.xlu0 %v670_v1  ;;  %v1495_v1 = vsel %vm75_vm0, 0.0, %v83_v46 }
 0x131   :  { %715 = vadd.xlane.f32.xlu2 %v669_v22  ;;  %713 = vadd.xlane.f32.xlu1 %v668_v59  ;;  %v256_v22 = vperm.slane %v1495_v1, 0  ;;  %v1514_v16 = vpop.permute.xlu0 %84 }
 0x133   :  { %v272_v28 = vmul.f32 %v256_v22, %v1289_v21  ;;  %v274_v2 = vmul.f32 %v256_v22, %v1287_v20 }
 0x134   :  { %v209_v25 = vpop.xlane.xlu2 %208  ;;  %v207_v8 = vpop.xlane.xlu1 %206 }
 0x135   :  { %v422_v46 = vperm.slane %v209_v25, %v1434_v44 }
 0x136   :  { %729 = vadd.xlane.f32.xlu0 %v676_v15 }
 0x139   :  { %727 = vadd.xlane.f32.xlu2 %v675_v17  ;;  %709 = vadd.xlane.f32.xlu1 %v666_v5  ;;  %v672_v17 = vmul.f32 %v1439_v51, %v1503_v31  ;;  %v137_v5 = vrot.slane %v1495_v1, 1 }
 0x13b   :  { %v1516_v25 = vperm.slane %v137_v5, 0 }
 0x13c   :  { %v213_v59 = vpop.xlane.xlu2 %212  ;;  %v211_v41 = vpop.xlane.xlu1 %210 }
 0x13d   :  { %v425_v15 = vperm.slane %v213_v59, %v1447_v61  ;;  %v423_v19 = vperm.slane %v211_v41, %v1442_v56 }
 0x13e   :  { %304 = vadd.xlane.f32.xlu0 %v272_v28  ;;  %v275_v28 = vmul.f32 %v256_v22, %v1297_v26  ;;  %v416_v26 = vperm.slane %v1474_v14, %v1442_v56 }
 0x13f   :  { %v424_v3 = vsel %vm405_vm1, %v423_v19, %v422_v46  ;;  %v1519_v19 = vld [vmem:[#allocation5 + $0x190] sm:$0xff] }
 0x140   :  { %v426_v21 = vsel %vm409_vm2, %v425_v15, %v424_v3  ;;  %v277_v3 = vmul.f32 %v1516_v25, %v1306_v33  ;;  %v673_v15 = vmul.f32 %v1439_v51, %v1519_v19 }
 0x141   :  { %308 = vadd.xlane.f32.xlu2 %v274_v2  ;;  %721 = vadd.xlane.f32.xlu1 %v672_v17  ;;  %v138_v2 = vrot.slane %v1495_v1, 2 }
 0x143   :  { %v1535_v33 = vperm.slane %v138_v2, 0 }
 0x144   :  { %v217_v59 = vpop.xlane.xlu2 %216  ;;  %v215_v41 = vpop.xlane.xlu1 %214 }
 0x145   :  { %v427_v20 = vperm.slane %v215_v41, %v1450_v0  ;;  %v418_v41 = vperm.slane %v1472_v29, %v1447_v61  ;;  %v429_v14 = vperm.slane %v217_v59, %v1434_v44 }
 0x146   :  { %310 = vadd.xlane.f32.xlu0 %v275_v28  ;;  %v420_v28 = vperm.slane %v207_v8, %v1450_v0  ;;  %v280_v8 = vmul.f32 %v1535_v33, %v1311_v38 }
 0x147   :  { %v428_v46 = vsel %vm413_vm3, %v427_v20, %v426_v21  ;;  %v278_v21 = vmul.f32 %v1516_v25, %v1304_v32 }
 0x149   :  { %314 = vadd.xlane.f32.xlu2 %v277_v3  ;;  %723 = vadd.xlane.f32.xlu1 %v673_v15  ;;  %v201_v17 = vpop.xlane.xlu0 %200 }
 0x14a   :  { %v415_v5 = vperm.slane %v201_v17, %v1434_v44 }
 0x14c   :  { %v417_v20 = vsel %vm405_vm1, %v416_v26, %v415_v5  ;;  %v221_v3 = vpop.xlane.xlu2 %220  ;;  %v219_v15 = vpop.xlane.xlu1 %218  ;;  %v273_v26 = vmul.f32 %v256_v22, %v1299_v27 }
 0x14d   :  { %v419_v17 = vsel %vm409_vm2, %v418_v41, %v417_v20  ;;  %v432_v51 = vperm.slane %v221_v3, %v1447_v61  ;;  %v430_v29 = vperm.slane %v219_v15, %v1442_v56  ;;  %v139_v15 = vrot.slane %v1495_v1, 3 }
 0x14e   :  { %v421_v32 = vsel %vm413_vm3, %v420_v28, %v419_v17  ;;  %316 = vadd.xlane.f32.xlu0 %v278_v21  ;;  %v281_v21 = vmul.f32 %v1535_v33, %v1319_v43  ;;  %v276_v43 = vmul.f32 %v1516_v25, %v1330_v52 }
 0x14f   :  { %v431_v2 = vsel %vm405_vm1, %v430_v29, %v429_v14  ;;  %v465_v5 = vsel %vm464_vm4, %v421_v32, %v1468_v30  ;;  %v259_v17 = vperm.slane %v139_v15, 0 }
 0x150   :  { %v433_v59 = vsel %vm409_vm2, %v432_v51, %v431_v2  ;;  %v467_v41 = vsel %vm466_vm5, %v428_v46, %v465_v5  ;;  %v283_v46 = vmul.f32 %v1535_v33, %v1326_v49  ;;  %v140_v49 = vrot.slane %v1495_v1, 4 }
 0x151   :  { %320 = vadd.xlane.f32.xlu2 %v280_v8  ;;  %306 = vadd.xlane.f32.xlu1 %v273_v26  ;;  %v227_v20 = vpop.xlane.xlu0 %226  ;;  %v284_v8 = vmul.f32 %v259_v17, %v1324_v48 }
 0x152   :  { %v437_v38 = vperm.slane %v227_v20, %v1442_v56 }
 0x154   :  { %v225_v3 = vpop.xlane.xlu2 %224  ;;  %v223_v28 = vpop.xlane.xlu1 %222 }
 0x155   :  { %v436_v27 = vperm.slane %v225_v3, %v1434_v44  ;;  %v434_v30 = vperm.slane %v223_v28, %v1450_v0  ;;  %v260_v28 = vperm.slane %v140_v49, 0 }
 0x156   :  { %322 = vadd.xlane.f32.xlu0 %v281_v21 }
 0x157   :  { %v438_v51 = vsel %vm405_vm1, %v437_v38, %v436_v27  ;;  %v435_v22 = vsel %vm413_vm3, %v434_v30, %v433_v59  ;;  %v286_v59 = vmul.f32 %v259_v17, %v1333_v54  ;;  %v287_v38 = vmul.f32 %v259_v17, %v1345_v63 }
 0x158   :  { %v469_v14 = vsel %vm468_vm6, %v435_v22, %v467_v41  ;;  %v279_v41 = vmul.f32 %v1516_v25, %v1313_v39  ;;  %v289_v39 = vmul.f32 %v260_v28, %v1340_v60  ;;  %v141_v25 = vrot.slane %v1495_v1, 5 }
 0x159   :  { %326 = vadd.xlane.f32.xlu2 %v283_v46  ;;  %312 = vadd.xlane.f32.xlu1 %v276_v43  ;;  %v233_v29 = vpop.xlane.xlu0 %232  ;;  %v282_v46 = vmul.f32 %v1535_v33, %v1317_v42 }
 0x15a   :  { %v443_v27 = vperm.slane %v233_v29, %v1434_v44  ;;  %v261_v60 = vperm.slane %v141_v25, 0 }
 0x15c   :  { %v231_v32 = vpop.xlane.xlu2 %230  ;;  %v229_v2 = vpop.xlane.xlu1 %228  ;;  %v292_v49 = vmul.f32 %v261_v60, %v1350_v4 }
 0x15d   :  { %v441_v26 = vperm.slane %v231_v32, %v1450_v0  ;;  %v439_v5 = vperm.slane %v229_v2, %v1447_v61 }
 0x15e   :  { %328 = vadd.xlane.f32.xlu0 %v284_v8  ;;  %v290_v8 = vmul.f32 %v260_v28, %v1355_v7 }
 0x15f   :  { %v440_v52 = vsel %vm409_vm2, %v439_v5, %v438_v51 }
 0x160   :  { %v442_v20 = vsel %vm413_vm3, %v441_v26, %v440_v52  ;;  %v285_v52 = vmul.f32 %v259_v17, %v1335_v55 }
 0x161   :  { %v471_v3 = vsel %vm470_vm7, %v442_v20, %v469_v14  ;;  %332 = vadd.xlane.f32.xlu2 %v286_v59  ;;  %318 = vadd.xlane.f32.xlu1 %v279_v41  ;;  %v239_v48 = vpop.xlane.xlu0 %238 }
 0x162   :  { %v448_v51 = vperm.slane %v239_v48, %v1450_v0  ;;  %v142_v48 = vrot.slane %v1495_v1, 6 }
 0x164   :  { %v237_v21 = vpop.xlane.xlu2 %236  ;;  %v235_v15 = vpop.xlane.xlu1 %234 }
 0x165   :  { %v446_v30 = vperm.slane %v237_v21, %v1447_v61  ;;  %v444_v54 = vperm.slane %v235_v15, %v1442_v56 }
 0x166   :  { %334 = vadd.xlane.f32.xlu0 %v287_v38  ;;  %v295_v38 = vmul.f32 %v261_v60, %v1359_v10 }
 0x167   :  { %v445_v22 = vsel %vm405_vm1, %v444_v54, %v443_v27  ;;  %v288_v27 = vmul.f32 %v260_v28, %v1343_v62 }
 0x168   :  { %v447_v63 = vsel %vm409_vm2, %v446_v30, %v445_v22  ;;  %v262_v30 = vperm.slane %v142_v48, 0 }
 0x169   :  { %v449_v43 = vsel %vm413_vm3, %v448_v51, %v447_v63  ;;  %338 = vadd.xlane.f32.xlu2 %v289_v39  ;;  %324 = vadd.xlane.f32.xlu1 %v282_v46  ;;  %v245_v14 = vpop.xlane.xlu0 %244  ;;  %v291_v63 = vmul.f32 %v260_v28, %v1353_v6 }
 0x16a   :  { %v473_v29 = vsel %vm472_vm8, %v449_v43, %v471_v3  ;;  %v453_v42 = vperm.slane %v245_v14, %v1447_v61  ;;  %v293_v3 = vmul.f32 %v261_v60, %v1364_v13  ;;  %v296_v51 = vmul.f32 %v262_v30, %v1374_v24 }
 0x16b   :  { %v298_v62 = vmul.f32 %v262_v30, %v1369_v18  ;;  %v143_v43 = vrot.slane %v1495_v1, 7  ;;  %v297_v48 = vmul.f32 %v262_v30, %v1372_v23 }
 0x16c   :  { %v243_v32 = vpop.xlane.xlu2 %242  ;;  %v241_v2 = vpop.xlane.xlu1 %240 }
 0x16d   :  { %v451_v26 = vperm.slane %v243_v32, %v1442_v56  ;;  %v450_v5 = vperm.slane %v241_v2, %v1434_v44  ;;  %v263_v32 = vperm.slane %v143_v43, 0 }
 0x16e   :  { %340 = vadd.xlane.f32.xlu0 %v290_v8 }
 0x16f   :  { %v452_v33 = vsel %vm405_vm1, %v451_v26, %v450_v5  ;;  %v299_v26 = vmul.f32 %v262_v30, %v1384_v37  ;;  %v300_v30 = vmul.f32 %v263_v32, %v1382_v36 }
 0x170   :  { %v454_v59 = vsel %vm409_vm2, %v453_v42, %v452_v33  ;;  %v301_v42 = vmul.f32 %v263_v32, %v1379_v34  ;;  %v294_v33 = vmul.f32 %v261_v60, %v1362_v12 }
 0x171   :  { %344 = vadd.xlane.f32.xlu2 %v292_v49  ;;  %330 = vadd.xlane.f32.xlu1 %v285_v52  ;;  %v251_v41 = vpop.xlane.xlu0 %250  ;;  %v1627_v49 = vsel %vm75_vm0, 0.0, %v1514_v16 }
 0x172   :  { %v458_v21 = vperm.slane %v251_v41, %v1442_v56  ;;  %v751_v41 = vperm.slane %v1627_v49, 0 }
 0x174   :  { %v249_v20 = vpop.xlane.xlu2 %248  ;;  %v247_v7 = vpop.xlane.xlu1 %246  ;;  %v769_v60 = vmul.f32 %v751_v41, %v1407_v58 }
 0x175   :  { %v457_v15 = vperm.slane %v249_v20, %v1434_v44  ;;  %v455_v4 = vperm.slane %v247_v7, %v1450_v0 }
 0x176   :  { %346 = vadd.xlane.f32.xlu0 %v293_v3  ;;  %v302_v3 = vmul.f32 %v263_v32, %v1398_v50  ;;  %v632_v50 = vrot.slane %v1627_v49, 1 }
 0x177   :  { %v459_v55 = vsel %vm405_vm1, %v458_v21, %v457_v15  ;;  %v456_v17 = vsel %vm413_vm3, %v455_v4, %v454_v59 }
 0x178   :  { %v475_v13 = vsel %vm474_vm9, %v456_v17, %v473_v29 }
 0x179   :  { %350 = vadd.xlane.f32.xlu2 %v295_v38  ;;  %336 = vadd.xlane.f32.xlu1 %v288_v27  ;;  %v690_v54 = vpop.xlane.xlu0 %689 }
 0x17a   :  { %v896_v5 = vperm.slane %v690_v54, %v1442_v56  ;;  %v752_v54 = vperm.slane %v632_v50, 0 }
 0x17c   :  { %v255_v39 = vpop.xlane.xlu2 %254  ;;  %v253_v25 = vpop.xlane.xlu1 %252  ;;  %v771_v36 = vmul.f32 %v752_v54, %v1421_v11  ;;  %v768_v11 = vmul.f32 %v751_v41, %v1393_v45 }
 0x17d   :  { %v462_v22 = vperm.slane %v255_v39, %v1450_v0  ;;  %v460_v46 = vperm.slane %v253_v25, %v1447_v61 }
 0x17e   :  { %352 = vadd.xlane.f32.xlu0 %v296_v51  ;;  %v772_v51 = vmul.f32 %v752_v54, %v1419_v9 }
 0x17f   :  { %v461_v10 = vsel %vm409_vm2, %v460_v46, %v459_v55  ;;  %v767_v55 = vmul.f32 %v751_v41, %v1405_v57 }
 0x180   :  { %v463_v14 = vsel %vm413_vm3, %v462_v22, %v461_v10  ;;  %v303_v10 = vmul.f32 %v263_v32, %v1396_v47 }
 0x181   :  { %v1615_v29 = vsel %vm476_vm10, %v463_v14, %v475_v13  ;;  %356 = vadd.xlane.f32.xlu2 %v298_v62  ;;  %342 = vadd.xlane.f32.xlu1 %v291_v63  ;;  %v694_v24 = vpop.xlane.xlu0 %693  ;;  %v770_v13 = vmul.f32 %v751_v41, %v1402_v53  ;;  %v633_v63 = vrot.slane %v1627_v49, 2 }
 0x182   :  { %v900_v1 = vperm.slane %v694_v24, %v1450_v0 }
 0x183   :  { %v753_v14 = vperm.slane %v633_v63, 0 }
 0x184   :  { %v688_v2 = vpop.xlane.xlu2 %687  ;;  %v692_v8 = vpop.xlane.xlu1 %691 }
 0x185   :  { %v895_v18 = vperm.slane %v688_v2, %v1434_v44  ;;  %v898_v6 = vperm.slane %v692_v8, %v1447_v61  ;;  %v773_v8 = vmul.f32 %v752_v54, %v1429_v35 }
 0x186   :  { %358 = vadd.xlane.f32.xlu0 %v299_v26 }
 0x187   :  { %v897_v28 = vsel %vm405_vm1, %v896_v5, %v895_v18 }
 0x188   :  { %v899_v37 = vsel %vm409_vm2, %v898_v6, %v897_v28  ;;  %v2016_v6 = vld [vmem:[#allocation14_spill] sm:$0xff]  ;;  %v634_v28 = vrot.slane %v1627_v49, 3 }
 0x189   :  { %v901_v52 = vsel %vm413_vm3, %v900_v1, %v899_v37  ;;  %362 = vadd.xlane.f32.xlu2 %v301_v42  ;;  %348 = vadd.xlane.f32.xlu1 %v294_v33  ;;  %v704_v59 = vpop.xlane.xlu0 %703  ;;  %v776_v1 = vmul.f32 %v753_v14, %v2016_v6 }
 0x18a   :  { %v909_v17 = vperm.slane %v704_v59, %v1434_v44  ;;  %v754_v37 = vperm.slane %v634_v28, 0 }
 0x18c   :  { %v698_v20 = vpop.xlane.xlu2 %697  ;;  %v696_v7 = vpop.xlane.xlu1 %695 }
 0x18d   :  { %v903_v34 = vperm.slane %v698_v20, %v1442_v56  ;;  %v902_v12 = vperm.slane %v696_v7, %v1434_v44  ;;  %v2017_v20 = vld [vmem:[#allocation18_spill] sm:$0xff] }
 0x18e   :  { %364 = vadd.xlane.f32.xlu0 %v302_v3  ;;  %v774_v45 = vmul.f32 %v752_v54, %v2017_v20  ;;  %v2021_v54 = vld [vmem:[#allocation17_spill] sm:$0xff] }
 0x18f   :  { %v904_v16 = vsel %vm405_vm1, %v903_v34, %v902_v12 }
 0x191   :  { %803 = vadd.xlane.f32.xlu2 %v769_v60  ;;  %354 = vadd.xlane.f32.xlu1 %v297_v48  ;;  %v712_v21 = vpop.xlane.xlu0 %711  ;;  %v2019_v48 = vld [vmem:[#allocation12_spill] sm:$0xff] }
 0x192   :  { %v916_v47 = vperm.slane %v712_v21, %v1434_v44  ;;  %v775_v21 = vmul.f32 %v753_v14, %v2019_v48 }
 0x194   :  { %v700_v15 = vpop.xlane.xlu2 %699  ;;  %v706_v4 = vpop.xlane.xlu1 %705 }
 0x195   :  { %v905_v38 = vperm.slane %v700_v15, %v1447_v61  ;;  %v910_v27 = vperm.slane %v706_v4, %v1442_v56 }
 0x196   :  { %799 = vadd.xlane.f32.xlu0 %v767_v55 }
 0x197   :  { %v906_v58 = vsel %vm409_vm2, %v905_v38, %v904_v16  ;;  %v911_v23 = vsel %vm405_vm1, %v910_v27, %v909_v17  ;;  %v2018_v16 = vld [vmem:[#allocation13_spill] sm:$0xff] }
 0x198   :  { %v779_v60 = vmul.f32 %v754_v37, %v2018_v16  ;;  %v2020_v38 = vld [vmem:[#allocation21_spill] sm:$0xff] }
 0x199   :  { %805 = vadd.xlane.f32.xlu2 %v770_v13  ;;  %360 = vadd.xlane.f32.xlu1 %v300_v30  ;;  %v720_v57 = vpop.xlane.xlu0 %719  ;;  %v780_v27 = vmul.f32 %v754_v37, %v2020_v38  ;;  %v778_v30 = vmul.f32 %v753_v14, %v1492_v40  ;;  %v2029_v38 = vld [vmem:[#allocation11_spill] sm:$0xff] }
 0x19c   :  { %v708_v39 = vpop.xlane.xlu2 %707  ;;  %v702_v25 = vpop.xlane.xlu1 %701 }
 0x19d   :  { %v912_v22 = vperm.slane %v708_v39, %v1447_v61  ;;  %v907_v46 = vperm.slane %v702_v25, %v1450_v0  ;;  %v777_v39 = vmul.f32 %v753_v14, %v2021_v54  ;;  %v635_v25 = vrot.slane %v1627_v49, 4 }
 0x19e   :  { %809 = vadd.xlane.f32.xlu0 %v772_v51 }
 0x19f   :  { %v913_v62 = vsel %vm409_vm2, %v912_v22, %v911_v23  ;;  %v908_v53 = vsel %vm413_vm3, %v907_v46, %v906_v58  ;;  %v923_v58 = vperm.slane %v720_v57, %v1434_v44  ;;  %v755_v22 = vperm.slane %v635_v25, 0  ;;  %v612_v25 = vld [vmem:[#allocation5 + $0x1c8] sm:$0xff] }
 0x1a0   :  { %v951_v43 = vsel %vm464_vm4, %v908_v53, %v901_v52  ;;  %v636_v57 = vrot.slane %v1627_v49, 5 }
 0x1a1   :  { %807 = vadd.xlane.f32.xlu2 %v771_v36  ;;  %366 = vadd.xlane.f32.xlu1 %v303_v10  ;;  %v718_v9 = vpop.xlane.xlu0 %717  ;;  %v784_v40 = vmul.f32 %v755_v22, %v1503_v31 }
 0x1a2   :  { %v921_v5 = vperm.slane %v718_v9, %v1450_v0  ;;  %v1696_v14 = vperm.slane %v636_v57, 0 }
 0x1a4   :  { %v716_v24 = vpop.xlane.xlu2 %715  ;;  %v714_v2 = vpop.xlane.xlu1 %713 }
 0x1a5   :  { %v919_v32 = vperm.slane %v716_v24, %v1447_v61  ;;  %v917_v26 = vperm.slane %v714_v2, %v1442_v56  ;;  %v1699_v24 = vadd.s32 4294967264, %v1434_v44 }
 0x1a6   :  { %811 = vadd.xlane.f32.xlu0 %v773_v8  ;;  %v1702_v8 = vadd.s32 4294967248, %v1434_v44 }
 0x1a7   :  { %v918_v18 = vsel %vm405_vm1, %v917_v26, %v916_v47  ;;  %v1705_v47 = vadd.s32 4294967240, %v1434_v44 }
 0x1a8   :  { %v920_v42 = vsel %vm409_vm2, %v919_v32, %v918_v18  ;;  %v1708_v32 = vadd.s32 4294967256, %v1434_v44 }
 0x1a9   :  { %v922_v35 = vsel %vm413_vm3, %v921_v5, %v920_v42  ;;  %817 = vadd.xlane.f32.xlu2 %v776_v1  ;;  %801 = vadd.xlane.f32.xlu1 %v768_v11  ;;  %v730_v33 = vpop.xlane.xlu0 %729  ;;  %v2024_v11 = vld [vmem:[#allocation24_spill] sm:$0xff] }
 0x1aa   :  { %v931_v41 = vperm.slane %v730_v33, %v1442_v56  ;;  %v787_v5 = vmul.f32 %v1696_v14, %v2024_v11  ;;  %v2025_v33 = vld [vmem:[#allocation19_spill] sm:$0xff] }
 0x1ac   :  { %v728_v52 = vpop.xlane.xlu2 %727  ;;  %v710_v59 = vpop.xlane.xlu1 %709 }
 0x1ad   :  { %v930_v7 = vperm.slane %v728_v52, %v1434_v44  ;;  %v914_v3 = vperm.slane %v710_v59, %v1450_v0  ;;  %v782_v52 = vmul.f32 %v754_v37, %v2025_v33 }
 0x1ae   :  { %813 = vadd.xlane.f32.xlu0 %v774_v45  ;;  %v609_v45 = vld [vmem:[#allocation5 + $0x1b0] sm:$0xff] }
 0x1af   :  { %v1672_v34 = vsel %vm405_vm1, %v931_v41, %v930_v7  ;;  %v915_v12 = vsel %vm413_vm3, %v914_v3, %v913_v62  ;;  %v2022_v62 = vld [vmem:[#allocation20_spill] sm:$0xff] }
 0x1b0   :  { %v952_v15 = vsel %vm466_vm5, %v915_v12, %v951_v43  ;;  %v781_v53 = vmul.f32 %v754_v37, %v2022_v62  ;;  %v2023_v43 = vld [vmem:[#allocation16_spill] sm:$0xff]  ;;  %v2026_v12 = vld [vmem:[#allocation22_spill] sm:$0xff] }
 0x1b1   :  { %823 = vadd.xlane.f32.xlu2 %v779_v60  ;;  %815 = vadd.xlane.f32.xlu1 %v775_v21  ;;  %v305_v4 = vpop.xlane.xlu0 %304  ;;  %v1679_v55 = vsel %vm468_vm6, %v922_v35, %v952_v15  ;;  %v783_v9 = vmul.f32 %v755_v22, %v2023_v43  ;;  %v785_v35 = vmul.f32 %v755_v22, %v1519_v19  ;;  %v606_v60 = vld [vmem:[#allocation5 + $0x198] sm:$0xff]  ;;  %v2027_v15 = vld [vmem:[#allocation15_spill] sm:$0xff] }
 0x1b2   :  { %v512_v18 = vperm.slane %v305_v4, %v1699_v24  ;;  %v677_v16 = vmul.f32 %v2026_v12, %v609_v45  ;;  %v674_v4 = vmul.f32 %v2027_v15, %v606_v60 }
 0x1b4   :  { %v309_v50 = vpop.xlane.xlu2 %308  ;;  %v722_v17 = vpop.xlane.xlu1 %721 }
 0x1b5   :  { %v924_v23 = vperm.slane %v722_v17, %v1442_v56  ;;  %v518_v1 = vperm.slane %v309_v50, %v1702_v8  ;;  %v2028_v50 = vld [vmem:[#allocation23_spill] sm:$0xff] }
 0x1b6   :  { %825 = vadd.xlane.f32.xlu0 %v780_v27  ;;  %v788_v17 = vmul.f32 %v1696_v14, %v2028_v50  ;;  %v627_v27 = vrot.slane %v2029_v38, 6 }
 0x1b7   :  { %v925_v13 = vsel %vm405_vm1, %v924_v23, %v923_v58 }
 0x1b9   :  { %821 = vadd.xlane.f32.xlu2 %v778_v30  ;;  %819 = vadd.xlane.f32.xlu1 %v777_v39  ;;  %v311_v51 = vpop.xlane.xlu0 %310  ;;  %v786_v39 = vmul.f32 %v755_v22, %v606_v60 }
 0x1ba   :  { %v522_v28 = vperm.slane %v311_v51, %v1705_v47  ;;  %v611_v51 = vld [vmem:[#allocation5 + $0x1c0] sm:$0xff] }
 0x1bc   :  { %v315_v46 = vpop.xlane.xlu2 %314  ;;  %v724_v10 = vpop.xlane.xlu1 %723 }
 0x1bd   :  { %v926_v36 = vperm.slane %v724_v10, %v1447_v61  ;;  %v526_v48 = vperm.slane %v315_v46, %v1708_v32  ;;  %v637_v46 = vrot.slane %v1627_v49, 6 }
 0x1be   :  { %827 = vadd.xlane.f32.xlu0 %v781_v53 }
 0x1bf   :  { %v1692_v63 = vsel %vm409_vm2, %v926_v36, %v925_v13  ;;  %v1733_v13 = vperm.slane %v627_v27, 0  ;;  %v614_v27 = vld [vmem:[#allocation5 + $0x1d8] sm:$0xff] }
 0x1c1   :  { %833 = vadd.xlane.f32.xlu2 %v784_v40  ;;  %831 = vadd.xlane.f32.xlu1 %v783_v9  ;;  %v317_v2 = vpop.xlane.xlu0 %316  ;;  %v680_v53 = vmul.f32 %v1733_v13, %v612_v25  ;;  %v679_v57 = vmul.f32 %v1733_v13, %v611_v51  ;;  %v1743_v40 = vperm.slane %v637_v46, 0 }
 0x1c2   :  { %v528_v19 = vperm.slane %v317_v2, %v1702_v8 }
 0x1c3   :  { %v792_v11 = vmul.f32 %v1743_v40, %v612_v25 }
 0x1c4   :  { %v321_v31 = vpop.xlane.xlu2 %320  ;;  %v307_v26 = vpop.xlane.xlu1 %306 }
 0x1c5   :  { %v514_v6 = vperm.slane %v307_v26, %v1708_v32  ;;  %v532_v9 = vperm.slane %v321_v31, %v1699_v24  ;;  %v789_v31 = vmul.f32 %v1696_v14, %v609_v45  ;;  %v610_v45 = vld [vmem:[#allocation5 + $0x1b8] sm:$0xff] }
 0x1c6   :  { %839 = vadd.xlane.f32.xlu0 %v787_v5  ;;  %v628_v5 = vrot.slane %v2029_v38, 7  ;;  %v790_v50 = vmul.f32 %v1696_v14, %v610_v45  ;;  %v638_v38 = vrot.slane %v1627_v49, 7  ;;  %v682_v14 = vmul.f32 %v1733_v13, %v614_v27 }
 0x1c7   :  { %v516_v42 = vsel %vm515_vm11, %v514_v6, %v512_v18 }
 0x1c8   :  { %v520_v59 = vsel %vm519_vm12, %v518_v1, %v516_v42  ;;  %v791_v42 = vmul.f32 %v1743_v40, %v611_v51  ;;  %v1760_v33 = vperm.slane %v628_v5, 0 }
 0x1c9   :  { %835 = vadd.xlane.f32.xlu2 %v785_v35  ;;  %829 = vadd.xlane.f32.xlu1 %v782_v52  ;;  %v323_v20 = vpop.xlane.xlu0 %322  ;;  %v524_v41 = vsel %vm523_vm13, %v522_v28, %v520_v59 }
 0x1ca   :  { %v533_v43 = vperm.slane %v323_v20, %v1708_v32  ;;  %v615_v20 = vld [vmem:[#allocation5 + $0x1e0] sm:$0xff] }
 0x1cc   :  { %v327_v7 = vpop.xlane.xlu2 %326  ;;  %v313_v3 = vpop.xlane.xlu1 %312  ;;  %v534_v6 = vsel %vm515_vm11, %v533_v43, %v532_v9  ;;  %v1064_v43 = vld [vmem:[%s1984_s3 + $0x20] sm:$0xff]  ;;  %v794_v9 = vmul.f32 %v1743_v40, %v614_v27 }
 0x1cd   :  { %v525_v21 = vperm.slane %v313_v3, %v1699_v24  ;;  %v537_v1 = vperm.slane %v327_v7, %v1705_v47  ;;  %v683_v3 = vmul.f32 %v1760_v33, %v615_v20 }
 0x1ce   :  { %731 = vadd.xlane.f32.xlu0 %v677_v16  ;;  %v613_v16 = vld [vmem:[#allocation5 + $0x1d0] sm:$0xff] }
 0x1cf   :  { %v527_v37 = vsel %vm515_vm11, %v526_v48, %v525_v21  ;;  %v681_v60 = vmul.f32 %v1733_v13, %v613_v16  ;;  %v678_v48 = vmul.f32 %v2026_v12, %v610_v45  ;;  %v793_v15 = vmul.f32 %v1743_v40, %v613_v16 }
 0x1d0   :  { %v529_v58 = vsel %vm519_vm12, %v528_v19, %v527_v37 }
 0x1d1   :  { %725 = vadd.xlane.f32.xlu2 %v674_v4  ;;  %841 = vadd.xlane.f32.xlu1 %v788_v17  ;;  %v1731_v23 = vpop.xlane.xlu0 %328  ;;  %v616_v4 = vld [vmem:[#allocation5 + $0x1e8] sm:$0xff] }
 0x1d2   :  { %v684_v17 = vmul.f32 %v1760_v33, %v616_v4 }
 0x1d4   :  { %v1735_v30 = vpop.xlane.xlu2 %332  ;;  %v319_v54 = vpop.xlane.xlu1 %318 }
 0x1d5   :  { %v530_v10 = vperm.slane %v319_v54, %v1705_v47  ;;  %v758_v54 = vperm.slane %v638_v38, 0 }
 0x1d6   :  { %837 = vadd.xlane.f32.xlu0 %v786_v39 }
 0x1d7   :  { %v531_v62 = vsel %vm523_vm13, %v530_v10, %v529_v58  ;;  %v1067_v58 = vld [vmem:[%s1984_s3 + $0x38] sm:$0xff]  ;;  %v796_v51 = vmul.f32 %v758_v54, %v616_v4  ;;  %v795_v49 = vmul.f32 %v758_v54, %v615_v20  ;;  %v1066_v10 = vld [vmem:[%s1984_s3 + $0x30] sm:$0xff] }
 0x1d8   :  { %v574_v36 = vsel %vm464_vm4, %v531_v62, %v524_v41  ;;  %1082 = vmatpush.msra.mxu1 %v1067_v58  ;;  %v1065_v62 = vld [vmem:[%s1984_s3 + $0x28] sm:$0xff] }
 0x1d9   :  { %737 = vadd.xlane.f32.xlu2 %v680_v53  ;;  %735 = vadd.xlane.f32.xlu1 %v679_v57  ;;  %v1745_v22 = vpop.xlane.xlu0 %334  ;;  %v617_v53 = vld [vmem:[#allocation5 + $0x1f0] sm:$0xff] }
 0x1da   :  { %1083 = vmatpush.msra.mxu1 %v1066_v10  ;;  %v797_v13 = vmul.f32 %v758_v54, %v617_v53 }
 0x1dc   :  { %v1749_v2 = vpop.xlane.xlu2 %338  ;;  %v325_v26 = vpop.xlane.xlu1 %324  ;;  %1084 = vmatpush.msra.mxu1 %v1065_v62 }
 0x1dd   :  { %v535_v18 = vperm.slane %v325_v26, %v1702_v8  ;;  %v685_v26 = vmul.f32 %v1760_v33, %v617_v53 }
 0x1de   :  { %849 = vadd.xlane.f32.xlu0 %v792_v11  ;;  %1085 = vmatpush.msra.mxu1 %v1064_v43  ;;  %v1063_v11 = vld [vmem:[%s1984_s3 + $0x18] sm:$0xff] }
 0x1df   :  { %v536_v28 = vsel %vm519_vm12, %v535_v18, %v534_v6  ;;  %v1062_v18 = vld [vmem:[%s1984_s3 + $0x10] sm:$0xff]  ;;  %v1061_v6 = vld [vmem:[%s1984_s3 + $0x8] sm:$0xff] }
 0x1e0   :  { %v538_v35 = vsel %vm523_vm13, %v537_v1, %v536_v28  ;;  %1086 = vmatpush.msra.mxu1 %v1063_v11  ;;  %v618_v28 = vld [vmem:[#allocation5 + $0x1f8] sm:$0xff] }
 0x1e1   :  { %v1763_v52 = vsel %vm466_vm5, %v538_v35, %v574_v36  ;;  %847 = vadd.xlane.f32.xlu2 %v791_v42  ;;  %843 = vadd.xlane.f32.xlu1 %v789_v31  ;;  %v1765_v59 = vpop.xlane.xlu0 %340  ;;  %v1060_v42 = vld [vmem:[%s1984_s3] sm:$0xff]  ;;  %v798_v35 = vmul.f32 %v758_v54, %v618_v28  ;;  %v686_v20 = vmul.f32 %v1760_v33, %v618_v28  ;;  %s1198_s3 = smov [#allocation8]  }
 0x1e2   :  { %1087 = vmatpush.msra.mxu1 %v1062_v18  ;;  %s1103_s23 = sshll.u32 %s1198_s3, 4  ;;  %s1104_s23 = int_to_ptr.vmem [resolvable:$true] %s1103_s23 }
 0x1e4   :  { %v1767_v41 = vpop.xlane.xlu2 %344  ;;  %v1769_v7 = vpop.xlane.xlu1 %330  ;;  %1088 = vmatpush.msra.mxu1 %v1061_v6 }
 0x1e5   :  { %v540_v31 = vperm.slane %v1769_v7, %v1708_v32  ;;  %v542_v7 = vperm.slane %v1735_v30, %v1702_v8  ;;  %v544_v30 = vperm.slane %v1745_v22, %v1705_v47 }
 0x1e6   :  { %743 = vadd.xlane.f32.xlu0 %v683_v3  ;;  %v539_v3 = vperm.slane %v1731_v23, %v1699_v24  ;;  %1089 = vmatpush.msra.mxu1 %v1060_v42  ;;  %v547_v23 = vperm.slane %v1749_v2, %v1708_v32 }
 0x1e8   :  { %v541_v45 = vsel %vm515_vm11, %v540_v31, %v539_v3 }
 0x1e9   :  { %739 = vadd.xlane.f32.xlu2 %v681_v60  ;;  %733 = vadd.xlane.f32.xlu1 %v678_v48  ;;  %v1774_v21 = vpop.xlane.xlu0 %346  ;;  %v543_v38 = vsel %vm519_vm12, %v542_v7, %v541_v45 }
 0x1ea   :  { %v554_v33 = vperm.slane %v1774_v21, %v1708_v32 }
 0x1ec   :  { %v1776_v19 = vpop.xlane.xlu2 %350  ;;  %v1778_v37 = vpop.xlane.xlu1 %336 }
 0x1ed   :  { %v546_v60 = vperm.slane %v1778_v37, %v1699_v24  ;;  %v553_v37 = vperm.slane %v1767_v41, %v1699_v24 }
 0x1ee   :  { %851 = vadd.xlane.f32.xlu0 %v793_v15 }
 0x1ef   :  { %v548_v21 = vsel %vm515_vm11, %v547_v23, %v546_v60  ;;  %v555_v58 = vsel %vm515_vm11, %v554_v33, %v553_v37 }
 0x1f1   :  { %845 = vadd.xlane.f32.xlu2 %v790_v50  ;;  %745 = vadd.xlane.f32.xlu1 %v684_v17  ;;  %v1784_v12 = vpop.xlane.xlu0 %352 }
 0x1f2   :  { %v560_v15 = vperm.slane %v1784_v12, %v1699_v24  ;;  %v549_v12 = vperm.slane %v1765_v59, %v1702_v8 }
 0x1f4   :  { %v1789_v39 = vpop.xlane.xlu2 %356  ;;  %v1791_v25 = vpop.xlane.xlu1 %342 }
 0x1f5   :  { %v551_v2 = vperm.slane %v1791_v25, %v1705_v47  ;;  %v563_v41 = vperm.slane %v1789_v39, %v1702_v8  ;;  %v550_v25 = vsel %vm519_vm12, %v549_v12, %v548_v21 }
 0x1f6   :  { %741 = vadd.xlane.f32.xlu0 %v682_v14  ;;  %v545_v14 = vsel %vm523_vm13, %v544_v30, %v543_v38 }
 0x1f7   :  { %v552_v62 = vsel %vm523_vm13, %v551_v2, %v550_v25 }
 0x1f9   :  { %857 = vadd.xlane.f32.xlu2 %v796_v51  ;;  %855 = vadd.xlane.f32.xlu1 %v795_v49  ;;  %v1794_v46 = vpop.xlane.xlu0 %358  ;;  %v558_v51 = vperm.slane %v1776_v19, %v1705_v47 }
 0x1fa   :  { %v565_v39 = vperm.slane %v1794_v46, %v1705_v47 }
 0x1fc   :  { %v363_v57 = vpop.xlane.xlu2 %362  ;;  %v349_v36 = vpop.xlane.xlu1 %348 }
 0x1fd   :  { %v556_v4 = vperm.slane %v349_v36, %v1702_v8  ;;  %v568_v49 = vperm.slane %v363_v57, %v1708_v32 }
 0x1fe   :  { %859 = vadd.xlane.f32.xlu0 %v797_v13  ;;  %v576_v13 = vsel %vm468_vm6, %v545_v14, %v1763_v52 }
 0x1ff   :  { %v557_v22 = vsel %vm519_vm12, %v556_v4, %v555_v58 }
 0x200   :  { %v559_v53 = vsel %vm523_vm13, %v558_v51, %v557_v22 }
 0x201   :  { %853 = vadd.xlane.f32.xlu2 %v794_v9  ;;  %747 = vadd.xlane.f32.xlu1 %v685_v26  ;;  %v365_v5 = vpop.xlane.xlu0 %364  ;;  %v577_v26 = vsel %vm470_vm7, %v552_v62, %v576_v13 }
 0x202   :  { %v570_v19 = vperm.slane %v365_v5, %v1702_v8  ;;  %v578_v6 = vsel %vm472_vm8, %v559_v53, %v577_v26 }
 0x204   :  { %v1816_v40 = vpop.xlane.xlu2 %803  ;;  %v355_v1 = vpop.xlane.xlu1 %354 }
 0x205   :  { %v561_v48 = vperm.slane %v355_v1, %v1708_v32  ;;  %v994_v33 = vperm.slane %v1816_v40, %v1702_v8 }
 0x207   :  { %v562_v27 = vsel %vm515_vm11, %v561_v48, %v560_v15 }
 0x208   :  { %v564_v59 = vsel %vm519_vm12, %v563_v41, %v562_v27 }
 0x209   :  { %861 = vadd.xlane.f32.xlu2 %v798_v35  ;;  %749 = vadd.xlane.f32.xlu1 %v686_v20  ;;  %v800_v16 = vpop.xlane.xlu0 %799  ;;  %v566_v43 = vsel %vm523_vm13, %v565_v39, %v564_v59 }
 0x20a   :  { %v579_v28 = vsel %vm474_vm9, %v566_v43, %v578_v6  ;;  %v991_v48 = vperm.slane %v800_v16, %v1699_v24 }
 0x20c   :  { %v806_v50 = vpop.xlane.xlu2 %805  ;;  %v361_v17 = vpop.xlane.xlu1 %360 }
 0x20d   :  { %v567_v54 = vperm.slane %v361_v17, %v1699_v24  ;;  %v996_v23 = vperm.slane %v806_v50, %v1705_v47 }
 0x20f   :  { %v569_v36 = vsel %vm515_vm11, %v568_v49, %v567_v54 }
 0x210   :  { %v571_v1 = vsel %vm519_vm12, %v570_v19, %v569_v36 }
 0x211   :  { %v810_v10 = vpop.xlane.xlu0 %809 }
 0x212   :  { %v999_v11 = vperm.slane %v810_v10, %v1708_v32 }
 0x214   :  { %v808_v57 = vpop.xlane.xlu2 %807  ;;  %v367_v9 = vpop.xlane.xlu1 %366 }
 0x215   :  { %v998_v18 = vperm.slane %v808_v57, %v1699_v24  ;;  %v572_v46 = vperm.slane %v367_v9, %v1705_v47 }
 0x217   :  { %v1000_v52 = vsel %vm515_vm11, %v999_v11, %v998_v18  ;;  %v573_v5 = vsel %vm523_vm13, %v572_v46, %v571_v1 }
 0x218   :  { %v580_v42 = vsel %vm476_vm10, %v573_v5, %v579_v28 }
 0x219   :  { %v583_v31 = vsel %vm582_vm14, %v1615_v29, %v580_v42  ;;  %v812_v35 = vpop.xlane.xlu0 %811 }
 0x21a   :  { %584 = vst.msk [vmem:[#allocation4] sm:$0xff] %vm75_vm0, %v583_v31  ;;  %v1001_v20 = vperm.slane %v812_v35, %v1702_v8 }
 0x21c   :  { %v1002_v3 = vsel %vm519_vm12, %v1001_v20, %v1000_v52  ;;  %v818_v45 = vpop.xlane.xlu2 %817  ;;  %v802_v60 = vpop.xlane.xlu1 %801 }
 0x21d   :  { %v992_v7 = vperm.slane %v802_v60, %v1708_v32  ;;  %v1006_v40 = vperm.slane %v818_v45, %v1708_v32 }
 0x21f   :  { %v993_v29 = vsel %vm515_vm11, %v992_v7, %v991_v48 }
 0x220   :  { %v995_v15 = vsel %vm519_vm12, %v994_v33, %v993_v29 }
 0x221   :  { %v997_v4 = vsel %vm523_vm13, %v996_v23, %v995_v15  ;;  %v814_v17 = vpop.xlane.xlu0 %813  ;;  %v1058_v37 = vld [vmem:[#allocation4] sm:$0xff] }
 0x222   :  { %v1003_v38 = vperm.slane %v814_v17, %v1705_v47  ;;  %1119 = vmatmul.msk.f32.vlgmr.msra.gmra.mxu1 %vm75_vm0, %v1058_v37 }
 0x224   :  { %v1004_v16 = vsel %vm523_vm13, %v1003_v38, %v1002_v3  ;;  %v824_v30 = vpop.xlane.xlu2 %823  ;;  %v816_v21 = vpop.xlane.xlu1 %815 }
 0x225   :  { %v1047_v50 = vsel %vm464_vm4, %v1004_v16, %v997_v4  ;;  %v1005_v2 = vperm.slane %v816_v21, %v1699_v24  ;;  %v1012_v58 = vperm.slane %v824_v30, %v1699_v24 }
 0x227   :  { %v1007_v27 = vsel %vm515_vm11, %v1006_v40, %v1005_v2 }
 0x229   :  { %v826_v12 = vpop.xlane.xlu0 %825 }
 0x22a   :  { %v1013_v41 = vperm.slane %v826_v12, %v1708_v32 }
 0x22c   :  { %v1014_v54 = vsel %vm515_vm11, %v1013_v41, %v1012_v58  ;;  %v822_v14 = vpop.xlane.xlu2 %821  ;;  %v820_v22 = vpop.xlane.xlu1 %819 }
 0x22d   :  { %v1010_v51 = vperm.slane %v822_v14, %v1705_v47  ;;  %v1008_v25 = vperm.slane %v820_v22, %v1702_v8 }
 0x22f   :  { %v1009_v49 = vsel %vm519_vm12, %v1008_v25, %v1007_v27 }
 0x230   :  { %v1011_v59 = vsel %vm523_vm13, %v1010_v51, %v1009_v49 }
 0x231   :  { %v828_v10 = vpop.xlane.xlu0 %827  ;;  %v1048_v62 = vsel %vm466_vm5, %v1011_v59, %v1047_v50 }
 0x232   :  { %v1015_v57 = vperm.slane %v828_v10, %v1702_v8 }
 0x234   :  { %v834_v39 = vpop.xlane.xlu2 %833  ;;  %v832_v53 = vpop.xlane.xlu1 %831  ;;  %v1016_v18 = vsel %vm519_vm12, %v1015_v57, %v1014_v54 }
 0x235   :  { %v1020_v36 = vperm.slane %v834_v39, %v1708_v32  ;;  %v1019_v13 = vperm.slane %v832_v53, %v1699_v24 }
 0x237   :  { %v1021_v19 = vsel %vm515_vm11, %v1020_v36, %v1019_v13 }
 0x239   :  { %v840_v43 = vpop.xlane.xlu0 %839 }
 0x23c   :  { %v836_v9 = vpop.xlane.xlu2 %835  ;;  %v830_v26 = vpop.xlane.xlu1 %829 }
 0x23d   :  { %v1017_v11 = vperm.slane %v830_v26, %v1705_v47  ;;  %v1022_v42 = vperm.slane %v836_v9, %v1702_v8 }
 0x23f   :  { %v1018_v46 = vsel %vm523_vm13, %v1017_v11, %v1016_v18  ;;  %v1023_v45 = vsel %vm519_vm12, %v1022_v42, %v1021_v19 }
 0x240   :  { %v1049_v6 = vsel %vm468_vm6, %v1018_v46, %v1048_v62 }
 0x241   :  { %v732_v1 = vpop.xlane.xlu0 %731 }
 0x244   :  { %v726_v52 = vpop.xlane.xlu2 %725  ;;  %v842_v5 = vpop.xlane.xlu1 %841 }
 0x245   :  { %v928_v28 = vperm.slane %v726_v52, %v1450_v0  ;;  %v1027_v58 = vperm.slane %v842_v5, %v1708_v32 }
 0x247   :  { %v929_v31 = vsel %vm413_vm3, %v928_v28, %v1692_v63  ;;  %v933_v63 = vperm.slane %v732_v1, %v1447_v61 }
 0x248   :  { %v954_v35 = vsel %vm470_vm7, %v929_v31, %v1679_v55 }
 0x249   :  { %v838_v20 = vpop.xlane.xlu0 %837  ;;  %v934_v38 = vsel %vm409_vm2, %v933_v63, %v1672_v34  ;;  %v1026_v34 = vperm.slane %v840_v43, %v1699_v24 }
 0x24a   :  { %v1024_v3 = vperm.slane %v838_v20, %v1705_v47 }
 0x24b   :  { %v1028_v39 = vsel %vm515_vm11, %v1027_v58, %v1026_v34 }
 0x24c   :  { %v1025_v60 = vsel %vm523_vm13, %v1024_v3, %v1023_v45  ;;  %v738_v48 = vpop.xlane.xlu2 %737  ;;  %v736_v7 = vpop.xlane.xlu1 %735 }
 0x24d   :  { %v1050_v33 = vsel %vm470_vm7, %v1025_v60, %v1049_v6  ;;  %v938_v14 = vperm.slane %v738_v48, %v1442_v56  ;;  %v937_v22 = vperm.slane %v736_v7, %v1434_v44 }
 0x24f   :  { %v939_v19 = vsel %vm405_vm1, %v938_v14, %v937_v22 }
 0x251   :  { %v850_v23 = vpop.xlane.xlu0 %849 }
 0x252   :  { %v1034_v53 = vperm.slane %v850_v23, %v1708_v32 }
 0x254   :  { %v848_v29 = vpop.xlane.xlu2 %847  ;;  %v844_v15 = vpop.xlane.xlu1 %843 }
 0x255   :  { %v1033_v51 = vperm.slane %v848_v29, %v1699_v24  ;;  %v1029_v25 = vperm.slane %v844_v15, %v1702_v8 }
 0x257   :  { %v1035_v26 = vsel %vm515_vm11, %v1034_v53, %v1033_v51  ;;  %v1030_v11 = vsel %vm519_vm12, %v1029_v25, %v1028_v39 }
 0x259   :  { %v744_v4 = vpop.xlane.xlu0 %743 }
 0x25a   :  { %v944_v6 = vperm.slane %v744_v4, %v1434_v44 }
 0x25c   :  { %v740_v17 = vpop.xlane.xlu2 %739  ;;  %v734_v37 = vpop.xlane.xlu1 %733 }
 0x25d   :  { %v935_v55 = vperm.slane %v734_v37, %v1450_v0  ;;  %v940_v49 = vperm.slane %v740_v17, %v1447_v61 }
 0x25f   :  { %v936_v16 = vsel %vm413_vm3, %v935_v55, %v934_v38  ;;  %v941_v1 = vsel %vm409_vm2, %v940_v49, %v939_v19 }
 0x260   :  { %v955_v30 = vsel %vm472_vm8, %v936_v16, %v954_v35 }
 0x261   :  { %v852_v21 = vpop.xlane.xlu0 %851 }
 0x262   :  { %v1036_v59 = vperm.slane %v852_v21, %v1702_v8 }
 0x264   :  { %v846_v40 = vpop.xlane.xlu2 %845  ;;  %v746_v50 = vpop.xlane.xlu1 %745  ;;  %v1037_v52 = vsel %vm519_vm12, %v1036_v59, %v1035_v26 }
 0x265   :  { %v1031_v10 = vperm.slane %v846_v40, %v1705_v47  ;;  %v945_v43 = vperm.slane %v746_v50, %v1442_v56 }
 0x267   :  { %v1032_v56 = vsel %vm523_vm13, %v1031_v10, %v1030_v11  ;;  %v946_v42 = vsel %vm405_vm1, %v945_v43, %v944_v6 }
 0x268   :  { %v1051_v31 = vsel %vm472_vm8, %v1032_v56, %v1050_v33 }
 0x269   :  { %v742_v12 = vpop.xlane.xlu0 %741 }
 0x26a   :  { %v942_v36 = vperm.slane %v742_v12, %v1450_v0 }
 0x26c   :  { %v858_v2 = vpop.xlane.xlu2 %857  ;;  %v856_v27 = vpop.xlane.xlu1 %855 }
 0x26d   :  { %v1041_v57 = vperm.slane %v858_v2, %v1708_v32  ;;  %v1040_v9 = vperm.slane %v856_v27, %v1699_v24  ;;  %v943_v32 = vsel %vm413_vm3, %v942_v36, %v941_v1 }
 0x26e   :  { %v956_v3 = vsel %vm474_vm9, %v943_v32, %v955_v30 }
 0x271   :  { %v860_v62 = vpop.xlane.xlu0 %859 }
 0x272   :  { %v1043_v18 = vperm.slane %v860_v62, %v1702_v8  ;;  %v1042_v8 = vsel %vm515_vm11, %v1041_v57, %v1040_v9 }
 0x274   :  { %v854_v41 = vpop.xlane.xlu2 %853  ;;  %v748_v54 = vpop.xlane.xlu1 %747  ;;  %v1044_v35 = vsel %vm519_vm12, %v1043_v18, %v1042_v8 }
 0x275   :  { %v1038_v13 = vperm.slane %v854_v41, %v1705_v47  ;;  %v947_v46 = vperm.slane %v748_v54, %v1447_v61 }
 0x277   :  { %v1039_v24 = vsel %vm523_vm13, %v1038_v13, %v1037_v52  ;;  %v948_v20 = vsel %vm409_vm2, %v947_v46, %v946_v42 }
 0x278   :  { %v1052_v45 = vsel %vm474_vm9, %v1039_v24, %v1051_v31 }
 0x27c   :  { %v862_v5 = vpop.xlane.xlu2 %861  ;;  %v750_v28 = vpop.xlane.xlu1 %749 }
 0x27d   :  { %v1045_v61 = vperm.slane %v862_v5, %v1705_v47  ;;  %v949_v44 = vperm.slane %v750_v28, %v1450_v0 }
 0x27f   :  { %v1046_v60 = vsel %vm523_vm13, %v1045_v61, %v1044_v35  ;;  %v950_v48 = vsel %vm413_vm3, %v949_v44, %v948_v20 }
 0x280   :  { %v1053_v7 = vsel %vm476_vm10, %v1046_v60, %v1052_v45  ;;  %v957_v47 = vsel %vm476_vm10, %v950_v48, %v956_v3 }
 0x281   :  { %v1055_v0 = vsel %vm582_vm14, %v957_v47, %v1053_v7 }
 0x282   :  { %1057 = vst.msk [vmem:[#allocation4 + $0x8] sm:$0xff] %vm75_vm0, %v1055_v0 }
 0x289   :  { %v1059_v33 = vld [vmem:[#allocation4 + $0x8] sm:$0xff] }
 0x28a   :  { %1120 = vmatmul.msk.f32.gmra.mxu1 %vm75_vm0, %v1059_v33 }
 0x29f   :  { %v1091_v23 = vpop.f32.mrf.mxu1 }
 0x2a0   :  { %1097 = vst [vmem:[#allocation8] sm:$0xff] %v1091_v23 }
 0x307   :  { %v1094_v29 = vpop.f32.mrf.mxu1 }
 0x308   :  { %1098 = vst [vmem:[#allocation8 + $0x8] sm:$0xff] %v1094_v29 }
 0x309   :  { %1111 = dma.vmem_to_hbm [thread:$0]  %s1104_s23, 256, %s1106_s0, [#allocation7], %s1195_s20, %s1195_s20, %s1196_s21  }
 0x30a   :  { %1192 = dma.done.wait [#allocation7], 256  }
 0x30b   :  { %1193 = vsyncadd [#allocation7], 4294967040 }
 0x30c   :  { %1116 = vsyncpa [#allocation6], 1 }
 0x30d   :  { %1117 = vsyncpa [#allocation7], 1 }

</bundles_post_ra>
